<compile_context>
chip_gen: v6e
topology: v6e:2x2x1
jax: 0.10.0
libtpu: 0.0.40
codegen_flags: <defaults>
</compile_context>

<pallas_src>
import functools

import jax
import jax.numpy as jnp
from jax.experimental import pallas as pl
from jax.experimental.pallas import tpu as pltpu

_LANE = 128
_ROW_TARGET = 256  # matmul rows per tile; fills 256-wide MXUs (v6e/v7x)


def _round_up(x, m):
    return ((x + m - 1) // m) * m


def _pick_oh_tile(oh, ow):
    """Output-row tile: multiple of 8, ~_ROW_TARGET matmul rows per tile."""
    t = max(1, _ROW_TARGET // max(ow, 1))
    t = _round_up(t, 8)
    t = min(t, _round_up(oh, 8))
    return t


def _conv_bn_relu_kernel(x_ref, w_ref, scale_ref, shift_ref, o_ref, *,
                         ksize, oh_tile, ow, o_out):
    """Fused conv (stride 1) + BN + ReLU for one (batch n, output-row tile).

    x_ref:     (1, Hp_pad, Wp, C)      bf16  padded NHWC input, full image of
                                             batch element n (constant along
                                             the row-tile axis -> one DMA / n)
    w_ref:     (KH, KW*C, O_pad)       bf16  conv weights, KW folded into K
    scale_ref: (1, O_pad)              f32   gamma / sqrt(var + eps)
    shift_ref: (1, O_pad)              f32   beta + (bias - mean) * scale
    o_ref:     (1, oh_tile*OW, O)      bf16  flat output slab (unpadded O)
    """
    KH, KW = ksize
    c = x_ref.shape[-1]
    o_pad = w_ref.shape[-1]

    j = pl.program_id(1)
    row0 = pl.multiple_of(j * oh_tile, oh_tile)

    acc = jnp.zeros((oh_tile * ow, o_pad), dtype=jnp.float32)
    for kh in range(KH):
        # Row window feeding tap-row kh: (oh_tile, Wp, C).
        rows = x_ref[0, pl.ds(row0 + kh, oh_tile), :, :]
        if KW == 1:
            patch = rows[:, :ow, :]                      # (oh_tile, OW, C)
        else:
            # Fold the KW taps into the contraction dim: (oh_tile, OW, KW*C).
            patch = jnp.concatenate(
                [rows[:, kw:kw + ow, :] for kw in range(KW)], axis=-1)
        patch = patch.reshape(oh_tile * ow, KW * c)
        acc += jnp.dot(patch, w_ref[kh],
                       preferred_element_type=jnp.float32)

    # f32 epilogue: per-channel BN scale + folded shift, then ReLU.
    y = jnp.maximum(acc * scale_ref[...] + shift_ref[...], 0.0)
    # Store only the real O channels (full-extent last dim -> legal block).
    o_ref[...] = y[:, :o_out].reshape(1, oh_tile * ow, o_out).astype(o_ref.dtype)


@functools.partial(jax.jit, static_argnames=("padding", "eps"))
def basic_conv2d(x_nchw, weight_ochw, bias, gamma, beta, running_mean,
                 running_var, *, padding=1, eps=1e-5):
    """BasicConv2d forward (eval-mode BN).  x_nchw: (N, C, H, W) float32."""
    N, C, H, W = x_nchw.shape
    O, Cw, KH, KW = weight_ochw.shape
    assert Cw == C

    OH = H + 2 * padding - KH + 1
    OW = W + 2 * padding - KW + 1
    O_pad = _round_up(O, _LANE)

    oh_tile = _pick_oh_tile(OH, OW)
    OH_pad = _round_up(OH, oh_tile)
    n_row_tiles = OH_pad // oh_tile
    Wp = W + 2 * padding
    Hp_pad = OH_pad + KH - 1          # rows needed by the last (padded) tile

    # ---- eval-mode BN fold (f32 epilogue; weights stay unscaled bf16) ------
    scale = gamma / jnp.sqrt(running_var + eps)                   # (O,)
    shift = beta + (bias - running_mean) * scale                  # (O,)
    scale_p = jnp.pad(scale, (0, O_pad - O)).reshape(1, O_pad).astype(jnp.float32)
    shift_p = jnp.pad(shift, (0, O_pad - O)).reshape(1, O_pad).astype(jnp.float32)

    # weights OIHW -> (KH, KW, C, O) -> (KH, KW*C, O_pad), bf16 for the MXU
    w = jnp.transpose(weight_ochw.astype(jnp.float32), (2, 3, 1, 0))
    w = w.reshape(KH, KW * C, O)
    w = jnp.pad(w, ((0, 0), (0, 0), (0, O_pad - O))).astype(jnp.bfloat16)

    # ---- layout + spatial halo (plain JAX glue) ----------------------------
    x = jnp.transpose(x_nchw, (0, 2, 3, 1)).astype(jnp.bfloat16)  # NHWC bf16
    x = jnp.pad(x, ((0, 0),
                    (padding, padding + (OH_pad - OH)),           # extra rows
                    (padding, padding),
                    (0, 0)))                                      # (N,Hp_pad,Wp,C)

    kernel = functools.partial(_conv_bn_relu_kernel,
                               ksize=(KH, KW), oh_tile=oh_tile,
                               ow=OW, o_out=O)

    out = pl.pallas_call(
        kernel,
        out_shape=jax.ShapeDtypeStruct((N, OH_pad * OW, O), jnp.bfloat16),
        grid=(N, n_row_tiles),
        in_specs=[
            pl.BlockSpec((1, Hp_pad, Wp, C), lambda n, j: (n, 0, 0, 0)),
            pl.BlockSpec((KH, KW * C, O_pad), lambda n, j: (0, 0, 0)),
            pl.BlockSpec((1, O_pad), lambda n, j: (0, 0)),
            pl.BlockSpec((1, O_pad), lambda n, j: (0, 0)),
        ],
        out_specs=pl.BlockSpec((1, oh_tile * OW, O), lambda n, j: (n, j, 0)),
        compiler_params=pltpu.CompilerParams(
            # N leads so v7x's two TensorCores take different batch elements.
            dimension_semantics=("parallel", "parallel"),
        ),
    )(x, w, scale_p, shift_p)

    # Strip padded output rows, back to NCHW/f32 (PyTorch convention).
    # TODO(synk): downstream GoogLeNet blocks could consume NHWC bf16 directly
    #             and skip this transpose/cast.
    out = out.reshape(N, OH_pad, OW, O)[:, :OH]
    return jnp.transpose(out, (0, 3, 1, 2)).astype(jnp.float32)


def _reference(x_nchw, weight_ochw, bias, gamma, beta, mean, var,
               *, padding=1, eps=1e-5):
    """Pure-JAX f32 reference for a sanity check."""
    y = jax.lax.conv_general_dilated(
        x_nchw, weight_ochw, window_strides=(1, 1),
        padding=[(padding, padding), (padding, padding)],
        dimension_numbers=("NCHW", "OIHW", "NCHW"))
    y = y + bias[None, :, None, None]
    y = (y - mean[None, :, None, None]) / jnp.sqrt(var[None, :, None, None] + eps)
    y = y * gamma[None, :, None, None] + beta[None, :, None, None]
    return jnp.maximum(y, 0.0)


if __name__ == "__main__":
    # BasicConv2d(input_channel=4, output_channel=8, kernel_size=3, padding=1)
    N, C, H, W = 2, 4, 16, 16
    O, KH, KW, PAD = 8, 3, 3, 1

    key = jax.random.PRNGKey(0)
    kx, kwt, kb, kg, kbe, km, kv = jax.random.split(key, 7)

    x = jax.random.normal(kx, (N, C, H, W), dtype=jnp.float32)
    weight = jax.random.normal(kwt, (O, C, KH, KW), dtype=jnp.float32) * 0.1
    bias = jax.random.normal(kb, (O,), dtype=jnp.float32) * 0.1
    gamma = 1.0 + 0.1 * jax.random.normal(kg, (O,), dtype=jnp.float32)
    beta = 0.1 * jax.random.normal(kbe, (O,), dtype=jnp.float32)
    running_mean = 0.1 * jax.random.normal(km, (O,), dtype=jnp.float32)
    running_var = jnp.abs(jax.random.normal(kv, (O,), dtype=jnp.float32)) + 0.5

    out = basic_conv2d(x, weight, bias, gamma, beta, running_mean, running_var,
                       padding=PAD)
    out = jax.block_until_ready(out)

    ref = _reference(x, weight, bias, gamma, beta, running_mean, running_var,
                     padding=PAD)
    assert out.shape == (N, O, H, W), out.shape
    err = float(jnp.max(jnp.abs(out - ref)))
    # bf16 matmul inputs + bf16 output -> looser tolerance than pure f32.
    assert jnp.allclose(out, ref, atol=5e-2, rtol=5e-2), err

    print("KERNEL_OK")
</pallas_src>

<mosaic_0001>
module attributes {stable_mosaic.version = 11 : i64} {
  func.func @_conv_bn_relu_kernel(%arg0: i32, %arg1: i32, %arg2: memref<1x18x18x4xbf16, #tpu.memory_space<vmem>>, %arg3: memref<3x12x128xbf16, #tpu.memory_space<vmem>>, %arg4: memref<1x128xf32, #tpu.memory_space<vmem>>, %arg5: memref<1x128xf32, #tpu.memory_space<vmem>>, %arg6: memref<1x256x8xbf16, #tpu.memory_space<vmem>>) attributes {dimension_semantics = [#tpu.dimension_semantics<parallel>, #tpu.dimension_semantics<parallel>], iteration_bounds = array<i64: 2, 1>, scalar_prefetch = 0 : i64, scratch_operands = 0 : i64, tpu.core_type = #tpu.core_type<tc>, window_params = [{transform_indices = @transform_0, window_bounds = array<i64: 1, 18, 18, 4>}, {pipeline_mode = #tpu.pipeline_mode<synchronous>, transform_indices = @transform_1, window_bounds = array<i64: 3, 12, 128>}, {pipeline_mode = #tpu.pipeline_mode<synchronous>, transform_indices = @transform_2, window_bounds = array<i64: 1, 128>}, {pipeline_mode = #tpu.pipeline_mode<synchronous>, transform_indices = @transform_3, window_bounds = array<i64: 1, 128>}, {transform_indices = @transform_4, window_bounds = array<i64: 1, 256, 8>}]} {
    %c16_i32 = arith.constant 16 : i32
    %0 = arith.muli %arg1, %c16_i32 : i32
    %1 = tpu.assume_multiple %0, 16 : i32
    %cst = arith.constant 0.000000e+00 : f32
    %2 = vector.broadcast %cst : f32 to vector<256x128xf32>
    %c0_i32 = arith.constant 0 : i32
    %3 = arith.addi %1, %c0_i32 : i32
    %c0 = arith.constant 0 : index
    %4 = arith.index_cast %3 : i32 to index
    %c0_0 = arith.constant 0 : index
    %c0_1 = arith.constant 0 : index
    %5 = vector.load %arg2[%c0, %4, %c0_0, %c0_1] : memref<1x18x18x4xbf16, #tpu.memory_space<vmem>>, vector<1x16x18x4xbf16>
    %6 = vector.shape_cast %5 : vector<1x16x18x4xbf16> to vector<16x18x4xbf16>
    %7 = vector.extract_strided_slice %6 {offsets = [0, 0, 0], sizes = [16, 16, 4], strides = [1, 1, 1]} : vector<16x18x4xbf16> to vector<16x16x4xbf16>
    %8 = vector.extract_strided_slice %6 {offsets = [0, 1, 0], sizes = [16, 16, 4], strides = [1, 1, 1]} : vector<16x18x4xbf16> to vector<16x16x4xbf16>
    %9 = vector.extract_strided_slice %6 {offsets = [0, 2, 0], sizes = [16, 16, 4], strides = [1, 1, 1]} : vector<16x18x4xbf16> to vector<16x16x4xbf16>
    %10 = tpu.concatenate %7, %8, %9 in 2 : vector<16x16x4xbf16>, vector<16x16x4xbf16>, vector<16x16x4xbf16> -> vector<16x16x12xbf16>
    %11 = vector.shape_cast %10 : vector<16x16x12xbf16> to vector<256x12xbf16>
    %c0_2 = arith.constant 0 : index
    %c0_3 = arith.constant 0 : index
    %c0_4 = arith.constant 0 : index
    %12 = vector.load %arg3[%c0_2, %c0_3, %c0_4] : memref<3x12x128xbf16, #tpu.memory_space<vmem>>, vector<1x12x128xbf16>
    %13 = vector.shape_cast %12 : vector<1x12x128xbf16> to vector<12x128xbf16>
    %cst_5 = arith.constant dense<0.000000e+00> : vector<256x128xf32>
    %14 = tpu.matmul %11, %13, %cst_5 {dimension_numbers = #tpu.dot_dimension_numbers<[1], [0], [0], [1], [0, 0, 1, 1], [], []>} : vector<256x12xbf16>, vector<12x128xbf16>, vector<256x128xf32> -> vector<256x128xf32>
    %15 = arith.addf %2, %14 : vector<256x128xf32>
    %c1_i32 = arith.constant 1 : i32
    %16 = arith.addi %1, %c1_i32 : i32
    %c0_6 = arith.constant 0 : index
    %17 = arith.index_cast %16 : i32 to index
    %c0_7 = arith.constant 0 : index
    %c0_8 = arith.constant 0 : index
    %18 = vector.load %arg2[%c0_6, %17, %c0_7, %c0_8] : memref<1x18x18x4xbf16, #tpu.memory_space<vmem>>, vector<1x16x18x4xbf16>
    %19 = vector.shape_cast %18 : vector<1x16x18x4xbf16> to vector<16x18x4xbf16>
    %20 = vector.extract_strided_slice %19 {offsets = [0, 0, 0], sizes = [16, 16, 4], strides = [1, 1, 1]} : vector<16x18x4xbf16> to vector<16x16x4xbf16>
    %21 = vector.extract_strided_slice %19 {offsets = [0, 1, 0], sizes = [16, 16, 4], strides = [1, 1, 1]} : vector<16x18x4xbf16> to vector<16x16x4xbf16>
    %22 = vector.extract_strided_slice %19 {offsets = [0, 2, 0], sizes = [16, 16, 4], strides = [1, 1, 1]} : vector<16x18x4xbf16> to vector<16x16x4xbf16>
    %23 = tpu.concatenate %20, %21, %22 in 2 : vector<16x16x4xbf16>, vector<16x16x4xbf16>, vector<16x16x4xbf16> -> vector<16x16x12xbf16>
    %24 = vector.shape_cast %23 : vector<16x16x12xbf16> to vector<256x12xbf16>
    %c1 = arith.constant 1 : index
    %c0_9 = arith.constant 0 : index
    %c0_10 = arith.constant 0 : index
    %25 = vector.load %arg3[%c1, %c0_9, %c0_10] : memref<3x12x128xbf16, #tpu.memory_space<vmem>>, vector<1x12x128xbf16>
    %26 = vector.shape_cast %25 : vector<1x12x128xbf16> to vector<12x128xbf16>
    %cst_11 = arith.constant dense<0.000000e+00> : vector<256x128xf32>
    %27 = tpu.matmul %24, %26, %cst_11 {dimension_numbers = #tpu.dot_dimension_numbers<[1], [0], [0], [1], [0, 0, 1, 1], [], []>} : vector<256x12xbf16>, vector<12x128xbf16>, vector<256x128xf32> -> vector<256x128xf32>
    %28 = arith.addf %15, %27 : vector<256x128xf32>
    %c2_i32 = arith.constant 2 : i32
    %29 = arith.addi %1, %c2_i32 : i32
    %c0_12 = arith.constant 0 : index
    %30 = arith.index_cast %29 : i32 to index
    %c0_13 = arith.constant 0 : index
    %c0_14 = arith.constant 0 : index
    %31 = vector.load %arg2[%c0_12, %30, %c0_13, %c0_14] : memref<1x18x18x4xbf16, #tpu.memory_space<vmem>>, vector<1x16x18x4xbf16>
    %32 = vector.shape_cast %31 : vector<1x16x18x4xbf16> to vector<16x18x4xbf16>
    %33 = vector.extract_strided_slice %32 {offsets = [0, 0, 0], sizes = [16, 16, 4], strides = [1, 1, 1]} : vector<16x18x4xbf16> to vector<16x16x4xbf16>
    %34 = vector.extract_strided_slice %32 {offsets = [0, 1, 0], sizes = [16, 16, 4], strides = [1, 1, 1]} : vector<16x18x4xbf16> to vector<16x16x4xbf16>
    %35 = vector.extract_strided_slice %32 {offsets = [0, 2, 0], sizes = [16, 16, 4], strides = [1, 1, 1]} : vector<16x18x4xbf16> to vector<16x16x4xbf16>
    %36 = tpu.concatenate %33, %34, %35 in 2 : vector<16x16x4xbf16>, vector<16x16x4xbf16>, vector<16x16x4xbf16> -> vector<16x16x12xbf16>
    %37 = vector.shape_cast %36 : vector<16x16x12xbf16> to vector<256x12xbf16>
    %c2 = arith.constant 2 : index
    %c0_15 = arith.constant 0 : index
    %c0_16 = arith.constant 0 : index
    %38 = vector.load %arg3[%c2, %c0_15, %c0_16] : memref<3x12x128xbf16, #tpu.memory_space<vmem>>, vector<1x12x128xbf16>
    %39 = vector.shape_cast %38 : vector<1x12x128xbf16> to vector<12x128xbf16>
    %cst_17 = arith.constant dense<0.000000e+00> : vector<256x128xf32>
    %40 = tpu.matmul %37, %39, %cst_17 {dimension_numbers = #tpu.dot_dimension_numbers<[1], [0], [0], [1], [0, 0, 1, 1], [], []>} : vector<256x12xbf16>, vector<12x128xbf16>, vector<256x128xf32> -> vector<256x128xf32>
    %41 = arith.addf %28, %40 : vector<256x128xf32>
    %c0_18 = arith.constant 0 : index
    %c0_19 = arith.constant 0 : index
    %42 = vector.load %arg4[%c0_18, %c0_19] : memref<1x128xf32, #tpu.memory_space<vmem>>, vector<1x128xf32>
    %43 = vector.broadcast %42 : vector<1x128xf32> to vector<256x128xf32>
    %44 = arith.mulf %41, %43 : vector<256x128xf32>
    %c0_20 = arith.constant 0 : index
    %c0_21 = arith.constant 0 : index
    %45 = vector.load %arg5[%c0_20, %c0_21] : memref<1x128xf32, #tpu.memory_space<vmem>>, vector<1x128xf32>
    %46 = vector.broadcast %45 : vector<1x128xf32> to vector<256x128xf32>
    %47 = arith.addf %44, %46 : vector<256x128xf32>
    %cst_22 = arith.constant 0.000000e+00 : f32
    %48 = vector.broadcast %cst_22 : f32 to vector<256x128xf32>
    %49 = arith.maximumf %47, %48 : vector<256x128xf32>
    %50 = vector.extract_strided_slice %49 {offsets = [0, 0], sizes = [256, 8], strides = [1, 1]} : vector<256x128xf32> to vector<256x8xf32>
    %51 = vector.shape_cast %50 : vector<256x8xf32> to vector<1x256x8xf32>
    %52 = arith.truncf %51 : vector<1x256x8xf32> to vector<1x256x8xbf16>
    %c0_23 = arith.constant 0 : index
    %c0_24 = arith.constant 0 : index
    %c0_25 = arith.constant 0 : index
    %53 = vector.load %arg6[%c0_23, %c0_24, %c0_25] : memref<1x256x8xbf16, #tpu.memory_space<vmem>>, vector<1x256x8xbf16>
    tpu.vector_store %arg6[%c0_23, %c0_24, %c0_25], %52 {strides = array<i32>} : memref<1x256x8xbf16, #tpu.memory_space<vmem>>, vector<1x256x8xbf16>,
    return
  }
  func.func @transform_0(%arg0: i32, %arg1: i32) -> (i32, i32, i32, i32) {
    %c0_i32 = arith.constant 0 : i32
    %c0_i32_0 = arith.constant 0 : i32
    %c0_i32_1 = arith.constant 0 : i32
    %c0_i32_2 = arith.constant 0 : i32
    return %arg0, %c0_i32, %c0_i32_0, %c0_i32_1 : i32, i32, i32, i32
  }
  func.func @transform_1(%arg0: i32, %arg1: i32) -> (i32, i32, i32) {
    %c0_i32 = arith.constant 0 : i32
    %c0_i32_0 = arith.constant 0 : i32
    %c0_i32_1 = arith.constant 0 : i32
    %c0_i32_2 = arith.constant 0 : i32
    return %c0_i32, %c0_i32_0, %c0_i32_1 : i32, i32, i32
  }
  func.func @transform_2(%arg0: i32, %arg1: i32) -> (i32, i32) {
    %c0_i32 = arith.constant 0 : i32
    %c0_i32_0 = arith.constant 0 : i32
    %c0_i32_1 = arith.constant 0 : i32
    return %c0_i32, %c0_i32_0 : i32, i32
  }
  func.func @transform_3(%arg0: i32, %arg1: i32) -> (i32, i32) {
    %c0_i32 = arith.constant 0 : i32
    %c0_i32_0 = arith.constant 0 : i32
    %c0_i32_1 = arith.constant 0 : i32
    return %c0_i32, %c0_i32_0 : i32, i32
  }
  func.func @transform_4(%arg0: i32, %arg1: i32) -> (i32, i32, i32) {
    %c0_i32 = arith.constant 0 : i32
    %c0_i32_0 = arith.constant 0 : i32
    return %arg0, %arg1, %c0_i32 : i32, i32, i32
  }
}

</mosaic_0001>

<bundles_post_ra>
// kernel: basic_conv2d.1
= control target key start
LH: loop header
LB: loop body
LE: loop exit
PB: predicated region body
PF: predicated region fallthrough
CT: control target
= control target key end

     0   :  { %s3565_s15 = smov 0   ;;  %s3567_s16 = smov 0   ;;  %s4666_s0 = inlined_call_operand.vmem [shape: bf16[2,18,18,4], index: 0, kind: input, shape index: {}]   ;;  %s4667_s1 = inlined_call_operand.vmem [shape: bf16[3,12,128], index: 1, kind: input, shape index: {}]   ;;  %s4668_s2 = inlined_call_operand.vmem [shape: f32[1,128], index: 2, kind: input, shape index: {}]   ;;  %s4669_s3 = inlined_call_operand.vmem [shape: f32[1,128], index: 3, kind: input, shape index: {}]   ;;  %s4670_s4 = inlined_call_operand.vmem [shape: bf16[2,256,8], index: 4, kind: output, shape index: {}]  }
   0x1   :  { %s3569_s17 = smov 0  }
   0x2 LB: > { %s26_s18 = sadd.s32 1, %s3532_s16  ;;  %p2881_p0 = scmp.ge.s32.totalorder %s3536_s17, 1  ;;  %s3536_s17 = sphi %s3569_s17, %s14_s17   ;;  %s3532_s16 = sphi %s3567_s16, %s4672_s16   ;;  %s3528_s15 = sphi %s3565_s15, %s4671_s15  }
   0x3   : > { %p28_p1 = scmp.ge.s32.totalorder %s26_s18, 2  ;;  %p176_p2 = scmp.lt.s32.totalorder %s3536_s17, 3 }
   0x5   : > { %s4674_s18 = smov (%p28_p1, %s26_s18), 0  ;;  %p177_p3 = pnand %p2881_p0, %p176_p2 }
   0x6   : > { %p206_p4 = scmp.lt.s32.totalorder (!%p177_p3), %s3528_s15, 1  ;;  %s3538_s23 = smov (!%p177_p3), 8  }
   0x7   : > { %180 = sbr.rel (%p177_p3) target bundleno = 535 (0x217), region = 36  ;;  %s3539_s24 = smov (!%p177_p3), 4  }
   0xc   : > { %s4676_s15 = smov (!%p206_p4, %s3528_s15), 1  ;;  %vm627_vm0 = vcmask 1046528   ;;  %vm402_vm1 = vsmask.f32 7424  ;;  %vm1365_vm2 = vcmask 1045504   ;;  %vm708_vm3 = vcmask 31744  }
   0xd   : > { %s3360_s19 = smul.u32 216, %s4676_s15  ;;  %vm741_vm4 = vcmask 64512   ;;  %vm1332_vm5 = vcmask 97280   ;;  %s3168_s9 = sshll.u32 %s4676_s15, 7  ;;  %vm2753_vm6 = vcmask 60416  }
   0xe   : > { %s4504_s12 = scalar_lea.vmem %s4670_s4, %s3168_s9 }
   0xf   : > { %s3589_s22 = scalar_lea.vmem %s4666_s0, %s3360_s19 }
  0x10   : > { %v3387_v0 = vld [vmem:[%s3589_s22 + $0x78] sm:$0xff]   ;;  %v3388_v1 = vld [vmem:[%s3589_s22 + $0x80] ss:$0 sps:$4 sm:$0x11]   ;;  %v3389_v2 = vld [vmem:[%s3589_s22 + $0x6c] sm:$0xff]  }
  0x11   : > { %v1207_v3 = vrot.slane %v3387_v0, 1  ;;  %v1208_v4 = vrot.slane %v3388_v1, 1  ;;  %v3390_v5 = vld [vmem:[%s3589_s22 + $0x74] ss:$0 sps:$4 sm:$0x11]   ;;  %v3391_v6 = vld [vmem:[%s3589_s22 + $0x18] sm:$0xff]  }
  0x12   : > { %v1204_v7 = vrot.slane %v3389_v2, 1  ;;  %v3393_v8 = vld [vmem:[%s3589_s22 + $0xc] sm:$0xff]   ;;  %v1205_v10 = vrot.slane %v3390_v5, 1  ;;  %v3392_v11 = vld [vmem:[%s3589_s22 + $0x20] ss:$0 sps:$4 sm:$0x11]  }
  0x13   : > { %v1209_v9 = vsel %vm627_vm0, %v1207_v3, %v1208_v4  ;;  %v1183_v12 = vrot.slane %v3391_v6, 1  ;;  %v1180_v13 = vrot.slane %v3393_v8, 1  ;;  %v1184_v15 = vrot.slane %v3392_v11, 1  ;;  %v3394_v16 = vld [vmem:[%s3589_s22 + $0x14] ss:$0 sps:$4 sm:$0x11]  }
  0x14   : > { %1246 = vrot.lane.b32.xlu0 %v1209_v9, %s3538_s23  ;;  %v1206_v14 = vsel %vm627_vm0, %v1204_v7, %v1205_v10  ;;  %v1053_v17 = vshrl.u32 %v3389_v2, 16  ;;  %v1055_v18 = vshll.u32 %v3389_v2, 16  ;;  %v1060_v19 = vshll.u32 %v3390_v5, 16  ;;  %v3605_v25 = vld [vmem:[%s3589_s22 + $0x84] sm:$0xff]   ;;  %v3614_v39 = vld [vmem:[%s3589_s22 + $0x90] sm:$0xff]   ;;  %v3641_v5 = vld [vmem:[%s3589_s22 + $0x9c] sm:$0xff]  }
  0x15   : > { %1244 = vrot.lane.b32.xlu1 %v1206_v14, %s3538_s23  ;;  %v957_v20 = vshrl.u32 %v3393_v8, 16  ;;  %v1185_v21 = vsel %vm627_vm0, %v1183_v12, %v1184_v15  ;;  %v1181_v22 = vrot.slane %v3394_v16, 1  ;;  %v959_v23 = vshll.u32 %v3393_v8, 16  ;;  %v3609_v34 = vld [vmem:[%s3589_s22 + $0x8c] ss:$0 sps:$4 sm:$0x11]  }
  0x16   : > { %v964_v24 = vshll.u32 %v3394_v16, 16  ;;  %v1057_v26 = vrot.slane %v1055_v18, 1  ;;  %v1062_v27 = vrot.slane %v1060_v19, 1  ;;  %v1065_v28 = vshrl.u32 %v3387_v0, 16  ;;  %v3618_v44 = vld [vmem:[%s3589_s22 + $0x24] sm:$0xff]  }
  0x17   : > { %v1067_v29 = vshll.u32 %v3387_v0, 16  ;;  %v1182_v30 = vsel %vm627_vm0, %v1180_v13, %v1181_v22  ;;  %v961_v31 = vrot.slane %v959_v23, 1  ;;  %v1072_v33 = vshll.u32 %v3388_v1, 16  ;;  %v3398_v52 = vld [vmem:[%s3589_s22 + $0x98] ss:$0 sps:$4 sm:$0x11]  }
  0x18   : > { %v966_v32 = vrot.slane %v964_v24, 1  ;;  %1228 = vrot.lane.b32.xlu0 %v1182_v30, %s3538_s23  ;;  %v1058_v35 = vor.u32 %v1057_v26, %v1053_v17  ;;  %v969_v37 = vshrl.u32 %v3391_v6, 16  ;;  %v971_v38 = vshll.u32 %v3391_v6, 16  ;;  %v3633_v0 = vld [vmem:[%s3589_s22 + $0x2c] ss:$0 sps:$4 sm:$0x11]  }
  0x19   : > { %1230 = vrot.lane.b32.xlu1 %v1185_v21, %s3538_s23  ;;  %v1069_v36 = vrot.slane %v1067_v29, 1  ;;  %v962_v40 = vor.u32 %v961_v31, %v957_v20  ;;  %v1074_v41 = vrot.slane %v1072_v33, 1  ;;  %v976_v42 = vshll.u32 %v3392_v11, 16  ;;  %v3636_v1 = vld [vmem:[%s3589_s22 + $0x30] sm:$0xff]  }
  0x1a   : > { %v1077_v43 = vshrl.u32 %v3605_v25, 16  ;;  %v1063_v45 = vsel %vm402_vm1, %v1058_v35, %v1062_v27  ;;  %v973_v47 = vrot.slane %v971_v38, 1  ;;  %v1079_v48 = vshll.u32 %v3605_v25, 16  ;;  %v3402_v11 = vld [vmem:[%s3589_s22 + $0x38] ss:$0 sps:$4 sm:$0x11]  }
  0x1b   : > { %v1070_v46 = vor.u32 %v1069_v36, %v1065_v28  ;;  %v967_v49 = vsel %vm402_vm1, %v962_v40, %v966_v32  ;;  %v978_v50 = vrot.slane %v976_v42, 1  ;;  %v1084_v51 = vshll.u32 %v3609_v34, 16  ;;  %v3653_v19 = vld [vmem:[%s3589_s22 + $0xa4] ss:$0 sps:$4 sm:$0x11]   ;;  %v3663_v28 = vld [vmem:[%s3589_s22 + $0xa8] sm:$0xff]  }
  0x1c   : > { %v1089_v53 = vshrl.u32 %v3614_v39, 16  ;;  %1164 = vrot.lane.b32.xlu0 %v1063_v45, %s3539_s24  ;;  %v974_v54 = vor.u32 %v973_v47, %v969_v37  ;;  %v1081_v55 = vrot.slane %v1079_v48, 1  ;;  %v1091_v56 = vshll.u32 %v3614_v39, 16  ;;  %v3669_v32 = vld [vmem:[%s3589_s22 + $0xb0] ss:$0 sps:$4 sm:$0x11]  }
  0x1d   : > { %1148 = vrot.lane.b32.xlu1 %v967_v49, %s3539_s24  ;;  %v1075_v57 = vsel %vm402_vm1, %v1070_v46, %v1074_v41  ;;  %v1086_v58 = vrot.slane %v1084_v51, 1  ;;  %v1096_v59 = vshll.u32 %v3398_v52, 16  ;;  %v1210_v63 = vrot.slane %v3605_v25, 1  ;;  %v3674_v36 = vld [vmem:[%s3589_s22 + $0x3c] sm:$0xff]   ;;  %v3685_v45 = vld [vmem:[%s3589_s22 + $0x48] sm:$0xff]  }
  0x1e   : > { %v979_v60 = vsel %vm402_vm1, %v974_v54, %v978_v50  ;;  %v1082_v61 = vor.u32 %v1081_v55, %v1077_v43  ;;  %v1093_v62 = vrot.slane %v1091_v56, 1  ;;  %v981_v3 = vshrl.u32 %v3618_v44, 16  ;;  %v3408_v43 = vld [vmem:[%s3589_s22 + $0x44] ss:$0 sps:$4 sm:$0x11]  }
  0x1f   : > { %v1098_v2 = vrot.slane %v1096_v59, 1  ;;  %v983_v4 = vshll.u32 %v3618_v44, 16  ;;  %v1211_v7 = vrot.slane %v3609_v34, 1  ;;  %v988_v8 = vshll.u32 %v3633_v0, 16 }
  0x20   : > { %1166 = vrot.lane.b32.xlu0 %v1075_v57, %s3539_s24  ;;  %v1094_v6 = vor.u32 %v1093_v62, %v1089_v53  ;;  %v1087_v9 = vsel %vm402_vm1, %v1082_v61, %v1086_v58  ;;  %v993_v12 = vshrl.u32 %v3636_v1, 16  ;;  %v995_v13 = vshll.u32 %v3636_v1, 16  ;;  %v3696_v58 = vld [vmem:[%s3589_s22 + $0xb4] sm:$0xff]  }
  0x21   : > { %1150 = vrot.lane.b32.xlu1 %v979_v60, %s3539_s24  ;;  %v985_v10 = vrot.slane %v983_v4, 1  ;;  %v990_v15 = vrot.slane %v988_v8, 1  ;;  %v1000_v18 = vshll.u32 %v3402_v11, 16  ;;  %v1213_v20 = vrot.slane %v3614_v39, 1 }
  0x22   : > { %v1099_v14 = vsel %vm402_vm1, %v1094_v6, %v1098_v2  ;;  %v997_v17 = vrot.slane %v995_v13, 1  ;;  %v1214_v21 = vrot.slane %v3398_v52, 1  ;;  %v1186_v22 = vrot.slane %v3618_v44, 1  ;;  %v3410_v52 = vld [vmem:[%s3589_s22 + $0x50] ss:$0 sps:$4 sm:$0x11]  }
  0x23   : > { %v986_v16 = vor.u32 %v985_v10, %v981_v3  ;;  %v1103_v23 = vshll.u32 %v3641_v5, 16  ;;  %v1212_v24 = vsel %vm627_vm0, %v1210_v63, %v1211_v7  ;;  %v1002_v27 = vrot.slane %v1000_v18, 1  ;;  %v3705_v3 = vld [vmem:[%s3589_s22 + $0xc0] sm:$0xff]   ;;  %v3708_v4 = vld [vmem:[%s3589_s22 + $0xbc] ss:$0 sps:$4 sm:$0x11]  }
  0x24   : > { %1168 = vrot.lane.b32.xlu0 %v1087_v9, %s3539_s24  ;;  %v998_v26 = vor.u32 %v997_v17, %v993_v12  ;;  %v1187_v29 = vrot.slane %v3633_v0, 1  ;;  %v1189_v30 = vrot.slane %v3636_v1, 1  ;;  %v1101_v31 = vshrl.u32 %v3641_v5, 16  ;;  %v3712_v6 = vld [vmem:[%s3589_s22 + $0xc8] ss:$0 sps:$4 sm:$0x11]  }
  0x25   : > { %1170 = vrot.lane.b32.xlu1 %v1099_v14, %s3539_s24  ;;  %v991_v25 = vsel %vm402_vm1, %v986_v16, %v990_v15  ;;  %v1105_v33 = vrot.slane %v1103_v23, 1  ;;  %v1108_v34 = vshll.u32 %v3653_v19, 16  ;;  %v1115_v35 = vshll.u32 %v3663_v28, 16  ;;  %v3723_v15 = vld [vmem:[%s3589_s22 + $0x54] sm:$0xff]  }
  0x26   : > { %v1215_v37 = vsel %vm627_vm0, %v1213_v20, %v1214_v21  ;;  %v1113_v38 = vshrl.u32 %v3663_v28, 16  ;;  %v1120_v39 = vshll.u32 %v3669_v32, 16  ;;  %v1003_v40 = vsel %vm402_vm1, %v998_v26, %v1002_v27 }
  0x27   : > { %v1190_v41 = vrot.slane %v3402_v11, 1  ;;  %v1117_v42 = vrot.slane %v1115_v35, 1  ;;  %v1007_v44 = vshll.u32 %v3674_v36, 16  ;;  %v1106_v46 = vor.u32 %v1105_v33, %v1101_v31 }
  0x28   : > { %1248 = vrot.lane.b32.xlu0 %v1212_v24, %s3538_s23  ;;  %v1110_v47 = vrot.slane %v1108_v34, 1  ;;  %v1122_v49 = vrot.slane %v1120_v39, 1  ;;  %v1005_v50 = vshrl.u32 %v3674_v36, 16  ;;  %v1188_v53 = vsel %vm627_vm0, %v1186_v22, %v1187_v29  ;;  %v3417_v29 = vld [vmem:[%s3589_s22 + $0x60] sm:$0xff]  }
  0x29   : > { %1152 = vrot.lane.b32.xlu1 %v991_v25, %s3539_s24  ;;  %v1118_v48 = vor.u32 %v1117_v42, %v1113_v38  ;;  %v1009_v51 = vrot.slane %v1007_v44, 1  ;;  %v1191_v54 = vsel %vm627_vm0, %v1189_v30, %v1190_v41  ;;  %v1012_v55 = vshll.u32 %v3408_v43, 16  ;;  %v3733_v25 = vld [vmem:[%s3589_s22 + $0x5c] ss:$0 sps:$4 sm:$0x11]  }
  0x2a   : > { %v1019_v56 = vshll.u32 %v3685_v45, 16  ;;  %v1216_v57 = vrot.slane %v3641_v5, 1  ;;  %v1111_v59 = vsel %vm402_vm1, %v1106_v46, %v1110_v47  ;;  %v1217_v61 = vrot.slane %v3653_v19, 1  ;;  %v3418_v39 = vld [vmem:[%s3589_s22 + $0x68] ss:$0 sps:$4 sm:$0x11]  }
  0x2b   : > { %v1123_v60 = vsel %vm402_vm1, %v1118_v48, %v1122_v49  ;;  %v1017_v62 = vshrl.u32 %v3685_v45, 16  ;;  %v1010_v63 = vor.u32 %v1009_v51, %v1005_v50  ;;  %v1014_v0 = vrot.slane %v1012_v55, 1  ;;  %v3752_v46 = vld [vmem:[%s3589_s22 + $0xc] sm:$0xff]   ;;  %v3756_v51 = vld [vmem:[%s3589_s22] sm:$0xff]  }
  0x2c   : > { %1250 = vrot.lane.b32.xlu0 %v1215_v37, %s3538_s23  ;;  %v1021_v1 = vrot.slane %v1019_v56, 1  ;;  %v1024_v2 = vshll.u32 %v3410_v52, 16  ;;  %v1127_v5 = vshll.u32 %v3696_v58, 16  ;;  %v1218_v7 = vsel %vm627_vm0, %v1216_v57, %v1217_v61  ;;  %v3422_v57 = vld [vmem:[%s3589_s22 + $0x8] ss:$0 sps:$4 sm:$0x11]  }
  0x2d   : > { %1154 = vrot.lane.b32.xlu1 %v1003_v40, %s3539_s24  ;;  %v1219_v8 = vrot.slane %v3663_v28, 1  ;;  %v1220_v9 = vrot.slane %v3669_v32, 1  ;;  %v1139_v10 = vshll.u32 %v3705_v3, 16  ;;  %v1015_v11 = vsel %vm402_vm1, %v1010_v63, %v1014_v0 }
  0x2e   : > { %v1022_v12 = vor.u32 %v1021_v1, %v1017_v62  ;;  %v1026_v13 = vrot.slane %v1024_v2, 1  ;;  %v1192_v14 = vrot.slane %v3674_v36, 1  ;;  %v1193_v16 = vrot.slane %v3408_v43, 1 }
  0x2f   : > { %v1195_v17 = vrot.slane %v3685_v45, 1  ;;  %v1196_v18 = vrot.slane %v3410_v52, 1  ;;  %v1125_v19 = vshrl.u32 %v3696_v58, 16  ;;  %v1129_v20 = vrot.slane %v1127_v5, 1 }
  0x30   : > { %1232 = vrot.lane.b32.xlu0 %v1188_v53, %s3538_s23  ;;  %v1132_v21 = vshll.u32 %v3708_v4, 16  ;;  %v1137_v22 = vshrl.u32 %v3705_v3, 16  ;;  %v1144_v23 = vshll.u32 %v3712_v6, 16  ;;  %v1141_v24 = vrot.slane %v1139_v10, 1 }
  0x31   : > { %1234 = vrot.lane.b32.xlu1 %v1191_v54, %s3538_s23  ;;  %v1221_v26 = vsel %vm627_vm0, %v1219_v8, %v1220_v9  ;;  %v1027_v27 = vsel %vm402_vm1, %v1022_v12, %v1026_v13  ;;  %v1031_v28 = vshll.u32 %v3723_v15, 16  ;;  %v1194_v30 = vsel %vm627_vm0, %v1192_v14, %v1193_v16  ;;  %v3761_v54 = vld [vmem:[%s3589_s22 + $0x14] ss:$0 sps:$4 sm:$0x11]  }
  0x32   : > { %v1134_v31 = vrot.slane %v1132_v21, 1  ;;  %v1197_v32 = vsel %vm627_vm0, %v1195_v17, %v1196_v18  ;;  %v1130_v33 = vor.u32 %v1129_v20, %v1125_v19  ;;  %v1029_v34 = vshrl.u32 %v3723_v15, 16  ;;  %v3786_v12 = vld [vmem:[%s3589_s22 + $0x2c] ss:$0 sps:$4 sm:$0x11]  }
  0x33   : > { %v1036_v35 = vshll.u32 %v3733_v25, 16  ;;  %v1142_v36 = vor.u32 %v1141_v24, %v1137_v22  ;;  %v1146_v37 = vrot.slane %v1144_v23, 1  ;;  %v1033_v38 = vrot.slane %v1031_v28, 1  ;;  %v3426_v17 = vld [vmem:[%s3589_s22 + $0x20] ss:$0 sps:$4 sm:$0x11]  }
  0x34   : > { %1172 = vrot.lane.b32.xlu0 %v1111_v59, %s3539_s24  ;;  %v1043_v40 = vshll.u32 %v3417_v29, 16  ;;  %v1222_v41 = vrot.slane %v3696_v58, 1  ;;  %v1135_v42 = vsel %vm402_vm1, %v1130_v33, %v1134_v31  ;;  %v1223_v43 = vrot.slane %v3708_v4, 1  ;;  %v3801_v28 = vld [vmem:[%s3589_s22 + $0x24] sm:$0xff]  }
  0x35   : > { %1174 = vrot.lane.b32.xlu1 %v1123_v60, %s3539_s24  ;;  %v1038_v44 = vrot.slane %v1036_v35, 1  ;;  %v1041_v45 = vshrl.u32 %v3417_v29, 16  ;;  %v1147_v47 = vsel %vm402_vm1, %v1142_v36, %v1146_v37  ;;  %v1034_v48 = vor.u32 %v1033_v38, %v1029_v34  ;;  %v3809_v35 = vld [vmem:[%s3589_s22 + $0x18] sm:$0xff]  }
  0x36   : > { %v1045_v49 = vrot.slane %v1043_v40, 1  ;;  %v1048_v50 = vshll.u32 %v3418_v39, 16  ;;  %v1225_v52 = vrot.slane %v3705_v3, 1  ;;  %v1226_v53 = vrot.slane %v3712_v6, 1  ;;  %v3778_v6 = vld [vmem:[%s3589_s22 + $0x24] sm:$0xff]  }
  0x37   : > { %v1224_v55 = vsel %vm627_vm0, %v1222_v41, %v1223_v43  ;;  %v418_v56 = vshll.u32 %v3752_v46, 16  ;;  %v1039_v58 = vsel %vm402_vm1, %v1034_v48, %v1038_v44  ;;  %v406_v61 = vshll.u32 %v3756_v51, 16  ;;  %v3430_v44 = vld [vmem:[%s3589_s22 + $0x20] ss:$0 sps:$4 sm:$0x11]  }
  0x38   : > { %1252 = vrot.lane.b32.xlu0 %v1218_v7, %s3538_s23  ;;  %v1046_v59 = vor.u32 %v1045_v49, %v1041_v45  ;;  %v1050_v60 = vrot.slane %v1048_v50, 1  ;;  %v1198_v62 = vrot.slane %v3723_v15, 1  ;;  %v1199_v63 = vrot.slane %v3733_v25, 1 }
  0x39   : > { %1156 = vrot.lane.b32.xlu1 %v1015_v11, %s3539_s24  ;;  %v1201_v0 = vrot.slane %v3417_v29, 1  ;;  %v1202_v1 = vrot.slane %v3418_v39, 1  ;;  %v1227_v2 = vsel %vm627_vm0, %v1225_v52, %v1226_v53  ;;  %v416_v3 = vshrl.u32 %v3752_v46, 16  ;;  %v3783_v11 = vld [vmem:[%s3589_s22 + $0x18] sm:$0xff]   ;;  %v3827_v52 = vld [vmem:[%s3589_s22 + $0x30] sm:$0xff]  }
  0x3a   : > { %v420_v4 = vrot.slane %v418_v56, 1  ;;  %v423_v5 = vshll.u32 %v3761_v54, 16  ;;  %v1051_v7 = vsel %vm402_vm1, %v1046_v59, %v1050_v60  ;;  %v404_v8 = vshrl.u32 %v3756_v51, 16  ;;  %v3428_v39 = vld [vmem:[%s3589_s22 + $0x2c] ss:$0 sps:$4 sm:$0x11]  }
  0x3b   : > { %v408_v9 = vrot.slane %v406_v61, 1  ;;  %v411_v10 = vshll.u32 %v3422_v57, 16  ;;  %v1200_v13 = vsel %vm627_vm0, %v1198_v62, %v1199_v63  ;;  %v1203_v14 = vsel %vm627_vm0, %v1201_v0, %v1202_v1  ;;  %v3836_v61 = vld [vmem:[%s3589_s22 + $0x44] ss:$0 sps:$4 sm:$0x11]  }
  0x3c   : > { %1254 = vrot.lane.b32.xlu0 %v1221_v26, %s3538_s23  ;;  %v425_v15 = vrot.slane %v423_v5, 1  ;;  %v1926_v16 = vshll.u32 %v3778_v6, 16  ;;  %v421_v18 = vor.u32 %v420_v4, %v416_v3  ;;  %v1914_v21 = vshll.u32 %v3783_v11, 16  ;;  %v3844_v1 = vld [vmem:[%s3589_s22 + $0x38] ss:$0 sps:$4 sm:$0x11]  }
  0x3d   : > { %1158 = vrot.lane.b32.xlu1 %v1027_v27, %s3539_s24  ;;  %v409_v19 = vor.u32 %v408_v9, %v404_v8  ;;  %v413_v20 = vrot.slane %v411_v10, 1  ;;  %v631_v22 = vrot.slane %v3752_v46, 1  ;;  %v632_v23 = vrot.slane %v3761_v54, 1 }
  0x3e   : > { %v628_v24 = vrot.slane %v3756_v51, 1  ;;  %v629_v25 = vrot.slane %v3422_v57, 1  ;;  %v1924_v26 = vshrl.u32 %v3778_v6, 16  ;;  %v1931_v27 = vshll.u32 %v3786_v12, 16  ;;  %v3824_v51 = vld [vmem:[%s3589_s22 + $0x3c] sm:$0xff]  }
  0x3f   : > { %v1928_v29 = vrot.slane %v1926_v16, 1  ;;  %v426_v31 = vsel %vm402_vm1, %v421_v18, %v425_v15  ;;  %v1912_v33 = vshrl.u32 %v3783_v11, 16  ;;  %v1916_v34 = vrot.slane %v1914_v21, 1 }
  0x40   : > { %1236 = vrot.lane.b32.xlu0 %v1194_v30, %s3538_s23  ;;  %v1919_v30 = vshll.u32 %v3426_v17, 16  ;;  %v1933_v37 = vrot.slane %v1931_v27, 1  ;;  %v442_v40 = vshll.u32 %v3801_v28, 16  ;;  %v633_v41 = vsel %vm627_vm0, %v631_v22, %v632_v23  ;;  %v3863_v22 = vld [vmem:[%s3589_s22 + $0x44] ss:$0 sps:$4 sm:$0x11]  }
  0x41   : > { %1238 = vrot.lane.b32.xlu1 %v1197_v32, %s3538_s23  ;;  %v414_v32 = vsel %vm402_vm1, %v409_v19, %v413_v20  ;;  %v1929_v36 = vor.u32 %v1928_v29, %v1924_v26  ;;  %v1917_v43 = vor.u32 %v1916_v34, %v1912_v33  ;;  %v430_v45 = vshll.u32 %v3809_v35, 16  ;;  %v3860_v19 = vld [vmem:[%s3589_s22 + $0x30] sm:$0xff]  }
  0x42   : > { %v1921_v38 = vrot.slane %v1919_v30, 1  ;;  %v2138_v46 = vrot.slane %v3778_v6, 1  ;;  %v2135_v48 = vrot.slane %v3783_v11, 1  ;;  %v2136_v49 = vrot.slane %v3426_v17, 1 }
  0x43   : > { %v440_v50 = vshrl.u32 %v3801_v28, 16  ;;  %v1934_v53 = vsel %vm402_vm1, %v1929_v36, %v1933_v37  ;;  %v444_v54 = vrot.slane %v442_v40, 1  ;;  %v428_v57 = vshrl.u32 %v3809_v35, 16  ;;  %v3888_v40 = vld [vmem:[%s3589_s22 + $0x54] sm:$0xff]  }
  0x44   : > { %1176 = vrot.lane.b32.xlu0 %v1135_v42, %s3539_s24  ;;  %v630_v42 = vsel %vm627_vm0, %v628_v24, %v629_v25  ;;  %v1922_v56 = vsel %vm402_vm1, %v1917_v43, %v1921_v38  ;;  %v435_v59 = vshll.u32 %v3430_v44, 16  ;;  %v637_v60 = vrot.slane %v3801_v28, 1  ;;  %v3871_v28 = vld [vmem:[%s3589_s22 + $0x38] ss:$0 sps:$4 sm:$0x11]  }
  0x45   : > { %1178 = vrot.lane.b32.xlu1 %v1147_v47, %s3539_s24  ;;  %v2139_v47 = vrot.slane %v3786_v12, 1  ;;  %v1950_v62 = vshll.u32 %v3824_v51, 16  ;;  %v2137_v0 = vsel %vm627_vm0, %v2135_v48, %v2136_v49  ;;  %v445_v3 = vor.u32 %v444_v54, %v440_v50 }
  0x46   : > { %v437_v6 = vrot.slane %v435_v59, 1  ;;  %v1948_v8 = vshrl.u32 %v3824_v51, 16  ;;  %v1955_v10 = vshll.u32 %v3836_v61, 16  ;;  %v1936_v11 = vshrl.u32 %v3827_v52, 16 }
  0x47   : > { %v2140_v63 = vsel %vm627_vm0, %v2138_v46, %v2139_v47  ;;  %v1952_v9 = vrot.slane %v1950_v62, 1  ;;  %v634_v17 = vrot.slane %v3809_v35, 1  ;;  %v635_v18 = vrot.slane %v3430_v44, 1  ;;  %v3893_v44 = vld [vmem:[%s3589_s22 + $0x48] sm:$0xff]  }
  0x48   : > { %1256 = vrot.lane.b32.xlu0 %v1224_v55, %s3538_s23  ;;  %v447_v55 = vshll.u32 %v3428_v39, 16  ;;  %v1957_v21 = vrot.slane %v1955_v10, 1  ;;  %v454_v29 = vshll.u32 %v3860_v19, 16  ;;  %v2144_v30 = vrot.slane %v3824_v51, 1 }
  0x49   : > { %1160 = vrot.lane.b32.xlu1 %v1039_v58, %s3539_s24  ;;  %v432_v58 = vrot.slane %v430_v45, 1  ;;  %v1953_v20 = vor.u32 %v1952_v9, %v1948_v8  ;;  %v636_v27 = vsel %vm627_vm0, %v634_v17, %v635_v18  ;;  %v2141_v34 = vrot.slane %v3827_v52, 1  ;;  %v3440_v46 = vld [vmem:[%s3589_s22 + $0x5c] ss:$0 sps:$4 sm:$0x11]  }
  0x4a   : > { %v449_v4 = vrot.slane %v447_v55, 1  ;;  %v2142_v35 = vrot.slane %v3844_v1, 1  ;;  %v459_v43 = vshll.u32 %v3871_v28, 16  ;;  %v1974_v50 = vshll.u32 %v3888_v40, 16 }
  0x4b   : > { %v433_v5 = vor.u32 %v432_v58, %v428_v57  ;;  %v1958_v33 = vsel %vm402_vm1, %v1953_v20, %v1957_v21  ;;  %v3442_v51 = vld [vmem:[%s3589_s22 + $0x50] ss:$0 sps:$4 sm:$0x11]   ;;  %v1962_v55 = vshll.u32 %v3893_v44, 16  ;;  %v644_v57 = vrot.slane %v3863_v22, 1 }
  0x4c   : > { %1258 = vrot.lane.b32.xlu0 %v1227_v2, %s3538_s23  ;;  %v1938_v2 = vshll.u32 %v3827_v52, 16  ;;  %v450_v15 = vsel %vm402_vm1, %v445_v3, %v449_v4  ;;  %v2143_v52 = vsel %vm627_vm0, %v2141_v34, %v2142_v35  ;;  %v461_v54 = vrot.slane %v459_v43, 1  ;;  %v3450_v35 = vld [vmem:[%s3589_s22 + $0x68] ss:$0 sps:$4 sm:$0x11]  }
  0x4d   : > { %1162 = vrot.lane.b32.xlu1 %v1051_v7, %s3539_s24  ;;  %v638_v7 = vrot.slane %v3428_v39, 1  ;;  %v438_v16 = vsel %vm402_vm1, %v433_v5, %v437_v6  ;;  %v471_v39 = vshll.u32 %v3863_v22, 16  ;;  %v640_v58 = vrot.slane %v3860_v19, 1  ;;  %v3920_v5 = vld [vmem:[%s3589_s22 + $0x48] sm:$0xff]  }
  0x4e   : > { %v1940_v12 = vrot.slane %v1938_v2, 1  ;;  %v641_v59 = vrot.slane %v3871_v28, 1  ;;  %v1960_v2 = vshrl.u32 %v3893_v44, 16  ;;  %v1964_v3 = vrot.slane %v1962_v55, 1 }
  0x4f   : > { %v639_v26 = vsel %vm627_vm0, %v637_v60, %v638_v7  ;;  %v473_v49 = vrot.slane %v471_v39, 1  ;;  %v1979_v60 = vshll.u32 %v3440_v46, 16  ;;  %v1967_v4 = vshll.u32 %v3442_v51, 16  ;;  %v3923_v7 = vld [vmem:[%s3589_s22 + $0x5c] ss:$0 sps:$4 sm:$0x11]  }
  0x50   : > { %1240 = vrot.lane.b32.xlu0 %v1200_v13, %s3538_s23  ;;  %v1943_v13 = vshll.u32 %v3844_v1, 16  ;;  %v1941_v23 = vor.u32 %v1940_v12, %v1936_v11  ;;  %v3446_v11 = vld [vmem:[%s3589_s22 + $0x50] ss:$0 sps:$4 sm:$0x11]   ;;  %v642_v12 = vsel %vm627_vm0, %v640_v58, %v641_v59  ;;  %v2151_v17 = vrot.slane %v3440_v46, 1 }
  0x51   : > { %1242 = vrot.lane.b32.xlu1 %v1203_v14, %s3538_s23  ;;  %v3854_v14 = vld [vmem:[%s3589_s22 + $0x3c] sm:$0xff]   ;;  %v1981_v6 = vrot.slane %v1979_v60, 1  ;;  %v2147_v18 = vrot.slane %v3893_v44, 1  ;;  %v483_v28 = vshll.u32 %v3446_v11, 16  ;;  %v647_v43 = vrot.slane %v3446_v11, 1 }
  0x52   : > { %v1945_v24 = vrot.slane %v1943_v13, 1  ;;  %v466_v25 = vshll.u32 %v3854_v14, 16  ;;  %v464_v37 = vshrl.u32 %v3854_v14, 16  ;;  %v1965_v13 = vor.u32 %v1964_v3, %v1960_v2 }
  0x54   : > { %595 = vrot.lane.b32.xlu0 %v414_v32, %s3539_s24  ;;  %v3451_v32 = vld [vmem:[%s4667_s1 + $0x8] sm:$0x3f]   ;;  %v1946_v36 = vsel %vm402_vm1, %v1941_v23, %v1945_v24  ;;  %v468_v38 = vrot.slane %v466_v25, 1  ;;  %v495_v23 = vshll.u32 %v3923_v7, 16 }
  0x55   : > { %597 = vrot.lane.b32.xlu1 %v426_v31, %s3539_s24  ;;  %v2145_v31 = vrot.slane %v3836_v61, 1  ;;  %3356 = vmatprep.subr.msk.bf16.mxu0 %vm1365_vm2, %v3451_v32  ;;  %v1367_v45 = vsel %vm1365_vm2, %v3451_v32, 0  ;;  %v3911_v61 = vld [vmem:[%s3589_s22 + $0x54] sm:$0xff]   ;;  %v3940_v24 = vld [vmem:[%s3589_s22 + $0x6c] sm:$0xff]  }
  0x56   : > { %3357 = vmatprep.subr.msk.bf16.mxu1 %vm1365_vm2, %v3451_v32  ;;  %3253 = vmatpush3.bf16.msra.mxu0 %v1367_v45  ;;  %v469_v48 = vor.u32 %v468_v38, %v464_v37  ;;  %v490_v10 = vshll.u32 %v3911_v61, 16  ;;  %v488_v21 = vshrl.u32 %v3911_v61, 16  ;;  %v1998_v34 = vshll.u32 %v3940_v24, 16 }
  0x57   : > { %3355 = vmatpush3.bf16.msra.mxu1 %v1367_v45  ;;  %v2146_v47 = vsel %vm627_vm0, %v2144_v30, %v2145_v31  ;;  %v3948_v30 = vld [vmem:[%s3589_s22 + $0x74] ss:$0 sps:$4 sm:$0x11]   ;;  %v485_v38 = vrot.slane %v483_v28, 1  ;;  %v1996_v44 = vshrl.u32 %v3940_v24, 16  ;;  %v3962_v45 = vld [vmem:[%s3589_s22 + $0x6c] sm:$0xff]  }
  0x58   : > { %676 = vrot.lane.b32.xlu0 %v630_v42, %s3538_s23  ;;  %v456_v42 = vrot.slane %v454_v29, 1  ;;  %v474_v62 = vsel %vm402_vm1, %v469_v48, %v473_v49  ;;  %v492_v22 = vrot.slane %v490_v10, 1  ;;  %v3945_v29 = vld [vmem:[%s3589_s22 + $0x60] sm:$0xff]   ;;  %v2000_v46 = vrot.slane %v1998_v34, 1 }
  0x59   : > { %678 = vrot.lane.b32.xlu1 %v633_v41, %s3538_s23  ;;  %v452_v41 = vshrl.u32 %v3860_v19, 16  ;;  %v2148_v19 = vrot.slane %v3442_v51, 1  ;;  %v1986_v39 = vshll.u32 %v3945_v29, 16  ;;  %v1984_v48 = vshrl.u32 %v3945_v29, 16 }
  0x5a   : > { %v1991_v49 = vshll.u32 %v3450_v35, 16  ;;  %v514_v59 = vshll.u32 %v3962_v45, 16  ;;  %v2156_v3 = vrot.slane %v3940_v24, 1 }
  0x5b   : > { %v2149_v32 = vsel %vm627_vm0, %v2147_v18, %v2148_v19  ;;  %v4002_v19 = vld [vmem:[%s3589_s22 + $0x78] sm:$0xff]  }
  0x5c   : > { %2103 = vrot.lane.b32.xlu0 %v1922_v56, %s3539_s24  ;;  %v643_v56 = vrot.slane %v3854_v14, 1  ;;  %v1969_v14 = vrot.slane %v1967_v4, 1  ;;  %v1993_v58 = vrot.slane %v1991_v49, 1  ;;  %v2157_v4 = vrot.slane %v3948_v30, 1 }
  0x5d   : > { %2105 = vrot.lane.b32.xlu1 %v1934_v53, %s3539_s24  ;;  %v457_v53 = vor.u32 %v456_v42, %v452_v41  ;;  %v650_v41 = vrot.slane %v3923_v7, 1  ;;  %v646_v42 = vrot.slane %v3920_v5, 1  ;;  %v2154_v7 = vrot.slane %v3450_v35, 1  ;;  %v3486_v35 = vld [vmem:[%s3589_s22 + $0x6c] sm:$0xff]  }
  0x5e   : > { %v645_v8 = vsel %vm627_vm0, %v643_v56, %v644_v57  ;;  %v1970_v25 = vsel %vm402_vm1, %v1965_v13, %v1969_v14  ;;  %v2001_v56 = vor.u32 %v2000_v46, %v1996_v44  ;;  %v516_v10 = vrot.slane %v514_v59, 1 }
  0x5f   : > { %v462_v1 = vsel %vm402_vm1, %v457_v53, %v461_v54  ;;  %v3971_v53 = vld [vmem:[%s3589_s22 + $0x60] sm:$0xff]   ;;  %v3974_v54 = vld [vmem:[%s3589_s22 + $0x74] ss:$0 sps:$4 sm:$0x11]   ;;  %v2010_v34 = vshll.u32 %v4002_v19, 16 }
  0x60   : > { %2183 = vrot.lane.b32.xlu0 %v2137_v0, %s3538_s23  ;;  %v1976_v0 = vrot.slane %v1974_v50, 1  ;;  %v500_v11 = vshrl.u32 %v3971_v53, 16  ;;  %v519_v14 = vshll.u32 %v3974_v54, 16  ;;  %v652_v49 = vrot.slane %v3971_v53, 1 }
  0x61   : > { %2185 = vrot.lane.b32.xlu1 %v2140_v63, %s3538_s23  ;;  %v1972_v63 = vshrl.u32 %v3888_v40, 16 }
  0x63   : > { %v1977_v9 = vor.u32 %v1976_v0, %v1972_v63  ;;  %v3984_v0 = vld [vmem:[%s3589_s22 + $0x68] ss:$0 sps:$4 sm:$0x11]  }
  0x64   : > { %599 = vrot.lane.b32.xlu0 %v438_v16, %s3539_s24  ;;  %v2150_v16 = vrot.slane %v3888_v40, 1  ;;  %v649_v40 = vrot.slane %v3911_v61, 1 }
  0x65   : > { %601 = vrot.lane.b32.xlu1 %v450_v15, %s3539_s24  ;;  %v478_v15 = vshll.u32 %v3920_v5, 16  ;;  %v1982_v20 = vsel %vm402_vm1, %v1977_v9, %v1981_v6  ;;  %v2153_v6 = vrot.slane %v3945_v29, 1  ;;  %v512_v9 = vshrl.u32 %v3962_v45, 16 }
  0x66   : > { %v2152_v31 = vsel %vm627_vm0, %v2150_v16, %v2151_v17  ;;  %v651_v60 = vsel %vm627_vm0, %v649_v40, %v650_v41  ;;  %v507_v16 = vshll.u32 %v3984_v0, 16  ;;  %v3480_v41 = vld [vmem:[%s4667_s1] sm:$0x3f]  }
  0x67   : > { %3358 = vmatprep.subr.msk.bf16.mxu1 %vm1365_vm2, %v3480_v41 }
  0x68   : > { %680 = vrot.lane.b32.xlu0 %v636_v27, %s3538_s23  ;;  %v480_v27 = vrot.slane %v478_v15, 1  ;;  %v509_v28 = vrot.slane %v507_v16, 1 }
  0x69   : > { %682 = vrot.lane.b32.xlu1 %v639_v26, %s3538_s23  ;;  %v476_v26 = vshrl.u32 %v3920_v5, 16 }
  0x6b   : > { %v481_v37 = vor.u32 %v480_v27, %v476_v26  ;;  %v521_v26 = vrot.slane %v519_v14, 1 }
  0x6c   : > { %2107 = vrot.lane.b32.xlu0 %v1946_v36, %s3539_s24  ;;  %v497_v36 = vrot.slane %v495_v23, 1 }
  0x6d   : > { %2109 = vrot.lane.b32.xlu1 %v1958_v33, %s3539_s24  ;;  %v493_v33 = vor.u32 %v492_v22, %v488_v21  ;;  %v486_v51 = vsel %vm402_vm1, %v481_v37, %v485_v38  ;;  %v2158_v21 = vsel %vm627_vm0, %v2156_v3, %v2157_v4  ;;  %v2155_v22 = vsel %vm627_vm0, %v2153_v6, %v2154_v7  ;;  %v3487_v37 = vld [vmem:[%s3589_s22 + $0xc] sm:$0xff]  }
  0x6e   : > { %v4057_v7 = vld [vmem:[%s3589_s22 + $0x8c] ss:$0 sps:$4 sm:$0x11]  }
  0x6f   : > { %v498_v50 = vsel %vm402_vm1, %v493_v33, %v497_v36  ;;  %v4014_v33 = vld [vmem:[%s3589_s22 + $0x80] ss:$0 sps:$4 sm:$0x11]  }
  0x70   : > { %2187 = vrot.lane.b32.xlu0 %v2143_v52, %s3538_s23  ;;  %v1988_v52 = vrot.slane %v1986_v39, 1  ;;  %v656_v39 = vrot.slane %v3974_v54, 1  ;;  %v2015_v59 = vshll.u32 %v4014_v33, 16 }
  0x71   : > { %2189 = vrot.lane.b32.xlu1 %v2146_v47, %s3538_s23  ;;  %v2003_v47 = vshll.u32 %v3948_v30, 16 }
  0x72   : > { %v1989_v63 = vor.u32 %v1988_v52, %v1984_v48  ;;  %v4041_v52 = vld [vmem:[%s3589_s22 + $0x78] sm:$0xff]  }
  0x73   : > { %v2005_v57 = vrot.slane %v2003_v47, 1 }
  0x74   : > { %603 = vrot.lane.b32.xlu0 %v462_v1, %s3539_s24  ;;  %v502_v1 = vshll.u32 %v3971_v53, 16  ;;  %v1994_v13 = vsel %vm402_vm1, %v1989_v63, %v1993_v58  ;;  %v2012_v58 = vrot.slane %v2010_v34, 1  ;;  %v3489_v63 = vld [vmem:[%s3589_s22 + $0x18] sm:$0xff]  }
  0x75   : > { %605 = vrot.lane.b32.xlu1 %v474_v62, %s3539_s24  ;;  %v648_v62 = vsel %vm627_vm0, %v646_v42, %v647_v43 }
  0x76   : > { %v504_v15 = vrot.slane %v502_v1, 1  ;;  %v1568_v1 = vsel %vm1365_vm2, %v3480_v41, 0 }
  0x78   : > { %684 = vrot.lane.b32.xlu0 %v642_v12, %s3538_s23  ;;  %v3996_v12 = vld [vmem:[%s3589_s22 + $0x84] sm:$0xff]   ;;  %v505_v27 = vor.u32 %v504_v15, %v500_v11 }
  0x79   : > { %686 = vrot.lane.b32.xlu1 %v645_v8, %s3538_s23  ;;  %v2006_v8 = vsel %vm402_vm1, %v2001_v56, %v2005_v57  ;;  %v2022_v23 = vshll.u32 %v3996_v12, 16  ;;  %v2020_v40 = vshrl.u32 %v3996_v12, 16  ;;  %v2008_v57 = vshrl.u32 %v4002_v19, 16 }
  0x7a   : > { %v510_v48 = vsel %vm402_vm1, %v505_v27, %v509_v28  ;;  %v524_v28 = vshrl.u32 %v4041_v52, 16 }
  0x7b   : > { %v2024_v44 = vrot.slane %v2022_v23, 1  ;;  %v2013_v16 = vor.u32 %v2012_v58, %v2008_v57  ;;  %v4106_v58 = vld [vmem:[%s3589_s22 + $0x98] ss:$0 sps:$4 sm:$0x11]  }
  0x7c   : > { %2111 = vrot.lane.b32.xlu0 %v1970_v25, %s3539_s24  ;;  %v517_v25 = vor.u32 %v516_v10, %v512_v9 }
  0x7d   : > { %2113 = vrot.lane.b32.xlu1 %v1982_v20, %s3539_s24  ;;  %v4005_v20 = vld [vmem:[%s3589_s22 + $0x8c] ss:$0 sps:$4 sm:$0x11]   ;;  %v2025_v4 = vor.u32 %v2024_v44, %v2020_v40  ;;  %v4091_v40 = vld [vmem:[%s3589_s22 + $0x90] sm:$0xff]  }
  0x7e   : > { %v2027_v46 = vshll.u32 %v4005_v20, 16  ;;  %v522_v47 = vsel %vm402_vm1, %v517_v25, %v521_v26  ;;  %v543_v25 = vshll.u32 %v4057_v7, 16 }
  0x80   : > { %2191 = vrot.lane.b32.xlu0 %v2149_v32, %s3538_s23  ;;  %v655_v32 = vrot.slane %v3962_v45, 1  ;;  %v2029_v6 = vrot.slane %v2027_v46, 1 }
  0x81   : > { %2193 = vrot.lane.b32.xlu1 %v2152_v31, %s3538_s23 }
  0x82   : > { %v657_v9 = vsel %vm627_vm0, %v655_v32, %v656_v39  ;;  %v3490_v32 = vld [vmem:[%s3589_s22 + $0x84] sm:$0xff]   ;;  %v2160_v39 = vrot.slane %v4014_v33, 1 }
  0x84   : > { %607 = vrot.lane.b32.xlu0 %v486_v51, %s3539_s24  ;;  %v4038_v51 = vld [vmem:[%s3589_s22 + $0x84] sm:$0xff]  }
  0x85   : > { %609 = vrot.lane.b32.xlu1 %v498_v50, %s3539_s24  ;;  %v653_v50 = vrot.slane %v3984_v0, 1  ;;  %v538_v11 = vshll.u32 %v4038_v51, 16  ;;  %v536_v23 = vshrl.u32 %v4038_v51, 16 }
  0x86   : > { %v3978_v55 = vpop.permute.xlu0 %1246 }
  0x87   : > { %v1245_v2 = vpop.permute.xlu1 %1244  ;;  %v654_v10 = vsel %vm627_vm0, %v652_v49, %v653_v50  ;;  %v540_v27 = vrot.slane %v538_v11, 1  ;;  %v3491_v49 = vld [vmem:[%s3589_s22 + $0x90] sm:$0xff]   ;;  %v3492_v11 = vld [vmem:[%s3589_s22 + $0x24] sm:$0xff]  }
  0x88   : > { %688 = vrot.lane.b32.xlu0 %v648_v62, %s3538_s23 }
  0x89   : > { %690 = vrot.lane.b32.xlu1 %v651_v60, %s3538_s23  ;;  %v3488_v60 = vld [vmem:[%s3589_s22 + $0x78] sm:$0xff]   ;;  %v541_v44 = vor.u32 %v540_v27, %v536_v23  ;;  %v4138_v23 = vld [vmem:[%s3589_s22 + $0xa4] ss:$0 sps:$4 sm:$0x11]  }
  0x8a   : > { %v1229_v18 = vpop.permute.xlu0 %1228 }
  0x8b   : > { %v1231_v17 = vpop.permute.xlu1 %1230 }
  0x8c   : > { %2115 = vrot.lane.b32.xlu0 %v1994_v13, %s3539_s24  ;;  %v4068_v13 = vld [vmem:[%s3589_s22 + $0x80] ss:$0 sps:$4 sm:$0x11]  }
  0x8d   : > { %2117 = vrot.lane.b32.xlu1 %v2006_v8, %s3539_s24  ;;  %v3485_v8 = vld [vmem:[%s4667_s1 + $0x10] sm:$0x3f]  }
  0x8e   : > { %v1165_v30 = vpop.permute.xlu0 %1164  ;;  %3359 = vmatprep.subr.msk.bf16.mxu0 %vm1365_vm2, %v3485_v8  ;;  %v2320_v26 = vsel %vm1365_vm2, %v3485_v8, 0 }
  0x8f   : > { %v1149_v31 = vpop.permute.xlu1 %1148  ;;  %v1277_v36 = vsel %vm708_vm3, %v3486_v35, %v1165_v30 }
  0x90   : > { %v1261_v38 = vsel %vm708_vm3, %v3487_v37, %v1149_v31  ;;  %2195 = vrot.lane.b32.xlu0 %v2155_v22, %s3538_s23  ;;  %v1309_v43 = vsel %vm741_vm4, %v1277_v36, %v1245_v2  ;;  %v2030_v22 = vsel %vm402_vm1, %v2025_v4, %v2029_v6  ;;  %v531_v31 = vshll.u32 %v4068_v13, 16  ;;  %v4119_v4 = vld [vmem:[%s3589_s22 + $0x9c] sm:$0xff]  }
  0x91   : > { %2197 = vrot.lane.b32.xlu1 %v2158_v21, %s3538_s23  ;;  %v1293_v42 = vsel %vm741_vm4, %v1261_v38, %v1229_v18  ;;  %3270 = vmatprep.mubr.msk.bf16.mxu1 %vm1332_vm5, %v1309_v43  ;;  %v2162_v18 = vrot.slane %v3996_v12, 1  ;;  %v2163_v21 = vrot.slane %v4005_v20, 1  ;;  %v4083_v20 = vld [vmem:[%s3589_s22 + $0x9c] sm:$0xff]   ;;  %v2159_v38 = vrot.slane %v4002_v19, 1 }
  0x92   : > { %3254 = vmatprep.mubr.msk.bf16.mxu0 %vm1332_vm5, %v1293_v42  ;;  %v1167_v54 = vpop.permute.xlu0 %1166  ;;  %v545_v43 = vrot.slane %v543_v25, 1  ;;  %v2046_v33 = vshll.u32 %v4083_v20, 16  ;;  %v562_v25 = vshll.u32 %v4119_v4, 16 }
  0x93   : > { %v1151_v56 = vpop.permute.xlu1 %1150  ;;  %v1279_v62 = vsel %vm708_vm3, %v3488_v60, %v1167_v54  ;;  %v2164_v42 = vsel %vm627_vm0, %v2162_v18, %v2163_v21  ;;  %v2161_v57 = vsel %vm627_vm0, %v2159_v38, %v2160_v39  ;;  %v2039_v18 = vshll.u32 %v4106_v58, 16 }
  0x94   : > { %v1263_v0 = vsel %vm708_vm3, %v3489_v63, %v1151_v56  ;;  %611 = vrot.lane.b32.xlu0 %v510_v48, %s3539_s24  ;;  %v1311_v3 = vsel %vm741_vm4, %v1279_v62, %v3978_v55  ;;  %v526_v55 = vshll.u32 %v4041_v52, 16  ;;  %v4099_v48 = vld [vmem:[%s3589_s22 + $0xa4] ss:$0 sps:$4 sm:$0x11]   ;;  %v661_v62 = vrot.slane %v4038_v51, 1 }
  0x95   : > { %613 = vrot.lane.b32.xlu1 %v522_v47, %s3539_s24  ;;  %v1295_v2 = vsel %vm741_vm4, %v1263_v0, %v1231_v17  ;;  %3271 = vmatmul.mubr.msk.bf16.vlgmr.msra.gmra.mxu1 %vm1332_vm5, %v1311_v3  ;;  %v2017_v17 = vrot.slane %v2015_v59, 1  ;;  %v533_v47 = vrot.slane %v531_v31, 1  ;;  %v2034_v59 = vshll.u32 %v4091_v40, 16 }
  0x96   : > { %3255 = vmatmul.mubr.msk.bf16.vlgmr.msra.gmra.mxu0 %vm1332_vm5, %v1295_v2  ;;  %v1169_v14 = vpop.permute.xlu0 %1168  ;;  %3287 = vmatpush3.bf16.msra.mxu1 %v1568_v1  ;;  %v528_v30 = vrot.slane %v526_v55, 1  ;;  %v662_v63 = vrot.slane %v4057_v7, 1  ;;  %v658_v0 = vrot.slane %v4041_v52, 1  ;;  %v659_v1 = vrot.slane %v4068_v13, 1  ;;  %v3493_v55 = vld [vmem:[%s3589_s22 + $0x30] sm:$0xff]  }
  0x97   : > { %v1171_v15 = vpop.permute.xlu1 %1170  ;;  %3321 = vmatpush3.bf16.msra.mxu0 %v2320_v26  ;;  %v1281_v34 = vsel %vm708_vm3, %v3490_v32, %v1169_v14  ;;  %v2018_v37 = vsel %vm402_vm1, %v2013_v16, %v2017_v17  ;;  %v2044_v2 = vshrl.u32 %v4083_v20, 16  ;;  %v2032_v3 = vshrl.u32 %v4091_v40, 16 }
  0x98   : > { %692 = vrot.lane.b32.xlu0 %v654_v10, %s3538_s23  ;;  %v529_v46 = vor.u32 %v528_v30, %v524_v28  ;;  %v1283_v50 = vsel %vm708_vm3, %v3491_v49, %v1171_v15  ;;  %v546_v6 = vsel %vm402_vm1, %v541_v44, %v545_v43  ;;  %v2048_v8 = vrot.slane %v2046_v33, 1  ;;  %v4126_v10 = vld [vmem:[%s3589_s22 + $0x90] sm:$0xff]   ;;  %v4145_v30 = vld [vmem:[%s3589_s22 + $0x98] ss:$0 sps:$4 sm:$0x11]  }
  0x99   : > { %694 = vrot.lane.b32.xlu1 %v657_v9, %s3538_s23  ;;  %v2051_v9 = vshll.u32 %v4099_v48, 16  ;;  %v2036_v17 = vrot.slane %v2034_v59, 1  ;;  %v663_v26 = vsel %vm627_vm0, %v661_v62, %v662_v63  ;;  %v550_v31 = vshll.u32 %v4126_v10, 16  ;;  %v4159_v49 = vld [vmem:[%s3589_s22 + $0xb4] sm:$0xff]   ;;  %v4167_v62 = vld [vmem:[%s3589_s22 + $0xa8] sm:$0xff]  }
  0x9a   : > { %v1249_v35 = vpop.permute.xlu0 %1248  ;;  %v534_v7 = vsel %vm402_vm1, %v529_v46, %v533_v47  ;;  %v2049_v27 = vor.u32 %v2048_v8, %v2044_v2  ;;  %v2168_v38 = vrot.slane %v4083_v20, 1  ;;  %v2169_v39 = vrot.slane %v4099_v48, 1  ;;  %v3495_v8 = vld [vmem:[%s3589_s22 + $0xa8] sm:$0xff]  }
  0x9b   : > { %v1153_v36 = vpop.permute.xlu1 %1152  ;;  %v1313_v41 = vsel %vm741_vm4, %v1281_v34, %v1249_v35  ;;  %v2053_v28 = vrot.slane %v2051_v9, 1  ;;  %v660_v35 = vsel %vm627_vm0, %v658_v0, %v659_v1  ;;  %v567_v43 = vshll.u32 %v4138_v23, 16 }
  0x9c   : > { %3274 = vmatprep.mubr.msk.bf16.mxu1 %vm1332_vm5, %v1313_v41  ;;  %2119 = vrot.lane.b32.xlu0 %v2018_v37, %s3539_s24  ;;  %v1265_v13 = vsel %vm708_vm3, %v3492_v11, %v1153_v36  ;;  %v2037_v36 = vor.u32 %v2036_v17, %v2032_v3  ;;  %v2041_v37 = vrot.slane %v2039_v18, 1  ;;  %v560_v41 = vshrl.u32 %v4119_v4, 16 }
  0x9d   : > { %2121 = vrot.lane.b32.xlu1 %v2030_v22, %s3539_s24  ;;  %v2054_v44 = vsel %vm402_vm1, %v2049_v27, %v2053_v28  ;;  %v548_v46 = vshrl.u32 %v4126_v10, 16  ;;  %v552_v47 = vrot.slane %v550_v31, 1  ;;  %v555_v33 = vshll.u32 %v4145_v30, 16  ;;  %v4195_v27 = vld [vmem:[%s3589_s22 + $0xb4] sm:$0xff]  }
  0x9e   : > { %v1251_v54 = vpop.permute.xlu0 %1250  ;;  %v2165_v59 = vrot.slane %v4091_v40, 1  ;;  %v569_v1 = vrot.slane %v567_v43, 1  ;;  %v2170_v2 = vsel %vm627_vm0, %v2168_v38, %v2169_v39  ;;  %v667_v17 = vrot.slane %v4119_v4, 1 }
  0x9f   : > { %v1155_v56 = vpop.permute.xlu1 %1154  ;;  %v1315_v60 = vsel %vm741_vm4, %v1283_v50, %v1251_v54  ;;  %v3494_v50 = vld [vmem:[%s3589_s22 + $0x9c] sm:$0xff]   ;;  %v553_v3 = vor.u32 %v552_v47, %v548_v46  ;;  %v668_v18 = vrot.slane %v4138_v23, 1  ;;  %v586_v47 = vshll.u32 %v4195_v27, 16 }
  0xa0   : > { %3275 = vmatmul.mubr.msk.bf16.gmra.mxu1 %vm1332_vm5, %v1315_v60  ;;  %2199 = vrot.lane.b32.xlu0 %v2161_v57, %s3538_s23  ;;  %v1267_v14 = vsel %vm708_vm3, %v3493_v55, %v1155_v56  ;;  %v2042_v57 = vsel %vm402_vm1, %v2037_v36, %v2041_v37  ;;  %v2166_v60 = vrot.slane %v4106_v58, 1  ;;  %v2070_v58 = vshll.u32 %v4159_v49, 16  ;;  %v4214_v46 = vld [vmem:[%s3589_s22 + $0xbc] ss:$0 sps:$4 sm:$0x11]  }
  0xa1   : > { %2201 = vrot.lane.b32.xlu1 %v2164_v42, %s3538_s23  ;;  %v564_v42 = vrot.slane %v562_v25, 1  ;;  %v665_v25 = vrot.slane %v4145_v30, 1  ;;  %v3497_v30 = vld [vmem:[%s3589_s22 + $0x48] sm:$0xff]  }
  0xa2   : > { %v1233_v15 = vpop.permute.xlu0 %1232  ;;  %v2167_v55 = vsel %vm627_vm0, %v2165_v59, %v2166_v60  ;;  %v2072_v23 = vrot.slane %v2070_v58, 1  ;;  %v591_v58 = vshll.u32 %v4214_v46, 16 }
  0xa3   : > { %v1235_v16 = vpop.permute.xlu1 %1234  ;;  %v1297_v21 = vsel %vm741_vm4, %v1265_v13, %v1233_v15  ;;  %v565_v0 = vor.u32 %v564_v42, %v560_v41  ;;  %v2058_v15 = vshll.u32 %v4167_v62, 16 }
  0xa4   : > { %v1299_v22 = vsel %vm741_vm4, %v1267_v14, %v1235_v16  ;;  %3258 = vmatprep.mubr.msk.bf16.mxu0 %vm1332_vm5, %v1297_v21  ;;  %615 = vrot.lane.b32.xlu0 %v534_v7, %s3539_s24  ;;  %v4175_v7 = vld [vmem:[%s3589_s22 + $0xbc] ss:$0 sps:$4 sm:$0x11]   ;;  %v4182_v14 = vld [vmem:[%s3589_s22 + $0xb0] ss:$0 sps:$4 sm:$0x11]  }
  0xa5   : > { %617 = vrot.lane.b32.xlu1 %v546_v6, %s3539_s24  ;;  %3259 = vmatmul.mubr.msk.bf16.gmra.mxu0 %vm1332_vm5, %v1299_v22  ;;  %v557_v6 = vrot.slane %v555_v33, 1  ;;  %v570_v21 = vsel %vm402_vm1, %v565_v0, %v569_v1  ;;  %v664_v22 = vrot.slane %v4126_v10, 1  ;;  %v2075_v31 = vshll.u32 %v4175_v7, 16 }
  0xa6   : > { %v1173_v32 = vpop.permute.xlu0 %1172  ;;  %v2060_v41 = vrot.slane %v2058_v15, 1  ;;  %v2063_v42 = vshll.u32 %v4182_v14, 16  ;;  %v669_v33 = vsel %vm627_vm0, %v667_v17, %v668_v18  ;;  %v2174_v1 = vrot.slane %v4159_v49, 1  ;;  %v3498_v15 = vld [vmem:[%s3589_s22 + $0xb4] sm:$0xff]  }
  0xa7   : > { %v1175_v34 = vpop.permute.xlu1 %1174  ;;  %v1285_v48 = vsel %vm708_vm3, %v3494_v50, %v1173_v32  ;;  %v558_v28 = vsel %vm402_vm1, %v553_v3, %v557_v6  ;;  %v2056_v32 = vshrl.u32 %v4167_v62, 16  ;;  %v666_v60 = vsel %vm627_vm0, %v664_v22, %v665_v25  ;;  %v4243_v25 = vld [vmem:[%s3589_s22 + $0xc0] sm:$0xff]  }
  0xa8   : > { %696 = vrot.lane.b32.xlu0 %v660_v35, %s3538_s23  ;;  %v1287_v9 = vsel %vm708_vm3, %v3495_v8, %v1175_v34  ;;  %v4202_v34 = vld [vmem:[%s3589_s22 + $0xa8] sm:$0xff]   ;;  %v3496_v35 = vld [vmem:[%s3589_s22 + $0x3c] sm:$0xff]   ;;  %v2065_v0 = vrot.slane %v2063_v42, 1  ;;  %v584_v3 = vshrl.u32 %v4195_v27, 16  ;;  %v588_v6 = vrot.slane %v586_v47, 1 }
  0xa9   : > { %698 = vrot.lane.b32.xlu1 %v663_v26, %s3538_s23  ;;  %v2068_v26 = vshrl.u32 %v4159_v49, 16  ;;  %v2172_v22 = vrot.slane %v4182_v14, 1  ;;  %v4258_v42 = vld [vmem:[%s3589_s22 + $0xc8] ss:$0 sps:$4 sm:$0x11]   ;;  %v673_v47 = vrot.slane %v4195_v27, 1 }
  0xaa   : > { %v1253_v54 = vpop.permute.xlu0 %1252 }
  0xab   : > { %v1157_v56 = vpop.permute.xlu1 %1156  ;;  %v1317_v63 = vsel %vm741_vm4, %v1285_v48, %v1253_v54  ;;  %v2073_v50 = vor.u32 %v2072_v23, %v2068_v26  ;;  %v2077_v48 = vrot.slane %v2075_v31, 1  ;;  %v4221_v54 = vld [vmem:[%s3589_s22 + $0xb0] ss:$0 sps:$4 sm:$0x11]   ;;  %v593_v23 = vrot.slane %v591_v58, 1 }
  0xac   : > { %3278 = vmatprep.mubr.msk.bf16.mxu1 %vm1332_vm5, %v1317_v63  ;;  %2123 = vrot.lane.b32.xlu0 %v2042_v57, %s3539_s24  ;;  %v1269_v36 = vsel %vm708_vm3, %v3496_v35, %v1157_v56  ;;  %v574_v56 = vshll.u32 %v4202_v34, 16  ;;  %v2061_v63 = vor.u32 %v2060_v41, %v2056_v32 }
  0xad   : > { %2125 = vrot.lane.b32.xlu1 %v2054_v44, %s3539_s24  ;;  %v2078_v8 = vsel %vm402_vm1, %v2073_v50, %v2077_v48  ;;  %v670_v48 = vrot.slane %v4202_v34, 1 }
  0xae   : > { %v1255_v11 = vpop.permute.xlu0 %1254  ;;  %v2066_v18 = vsel %vm402_vm1, %v2061_v63, %v2065_v0  ;;  %v3500_v0 = vld [vmem:[%s3589_s22 + $0x54] sm:$0xff]  }
  0xaf   : > { %v1159_v13 = vpop.permute.xlu1 %1158  ;;  %v1319_v16 = vsel %vm741_vm4, %v1287_v9, %v1255_v11  ;;  %v572_v9 = vshrl.u32 %v4202_v34, 16  ;;  %v576_v11 = vrot.slane %v574_v56, 1  ;;  %v671_v56 = vrot.slane %v4221_v54, 1 }
  0xb0   : > { %3279 = vmatmul.mubr.msk.bf16.gmra.mxu1 %vm1332_vm5, %v1319_v16  ;;  %2203 = vrot.lane.b32.xlu0 %v2167_v55, %s3538_s23  ;;  %v1271_v37 = vsel %vm708_vm3, %v3497_v30, %v1159_v13  ;;  %v579_v13 = vshll.u32 %v4221_v54, 16  ;;  %v4235_v55 = vld [vmem:[%s3589_s22 + $0xcc] sm:$0xff]   ;;  %v3499_v30 = vld [vmem:[%s3589_s22 + $0xc0] sm:$0xff]  }
  0xb1   : > { %2205 = vrot.lane.b32.xlu1 %v2170_v2, %s3538_s23  ;;  %v2175_v2 = vrot.slane %v4175_v7, 1  ;;  %v577_v32 = vor.u32 %v576_v11, %v572_v9  ;;  %v2094_v14 = vshll.u32 %v4235_v55, 16 }
  0xb2   : > { %v1237_v38 = vpop.permute.xlu0 %1236  ;;  %v581_v35 = vrot.slane %v579_v13, 1 }
  0xb3   : > { %v1239_v39 = vpop.permute.xlu1 %1238  ;;  %v1301_v43 = vsel %vm741_vm4, %v1269_v36, %v1237_v38  ;;  %v2176_v31 = vsel %vm627_vm0, %v2174_v1, %v2175_v2  ;;  %v4251_v36 = vld [vmem:[%s3589_s22 + $0xd4] ss:$0 sps:$4 sm:$0x11]   ;;  %v3501_v2 = vld [vmem:[%s3589_s22 + $0x60] sm:$0xff]  }
  0xb4   : > { %v1303_v44 = vsel %vm741_vm4, %v1271_v37, %v1239_v39  ;;  %3262 = vmatprep.mubr.msk.bf16.mxu0 %vm1332_vm5, %v1301_v43  ;;  %619 = vrot.lane.b32.xlu0 %v558_v28, %s3539_s24  ;;  %v589_v28 = vor.u32 %v588_v6, %v584_v3  ;;  %v2082_v43 = vshll.u32 %v4243_v25, 16  ;;  %v2099_v63 = vshll.u32 %v4251_v36, 16 }
  0xb5   : > { %621 = vrot.lane.b32.xlu1 %v570_v21, %s3539_s24  ;;  %3263 = vmatmul.mubr.msk.bf16.gmra.mxu0 %vm1332_vm5, %v1303_v44  ;;  %v2171_v21 = vrot.slane %v4167_v62, 1 }
  0xb6   : > { %v1177_v57 = vpop.permute.xlu0 %1176  ;;  %v594_v50 = vsel %vm402_vm1, %v589_v28, %v593_v23  ;;  %v2084_v54 = vrot.slane %v2082_v43, 1  ;;  %v2180_v28 = vrot.slane %v4235_v55, 1  ;;  %v2181_v23 = vrot.slane %v4251_v36, 1 }
  0xb7   : > { %v1179_v59 = vpop.permute.xlu1 %1178  ;;  %v1289_v7 = vsel %vm708_vm3, %v3498_v15, %v1177_v57  ;;  %v2173_v41 = vsel %vm627_vm0, %v2171_v21, %v2172_v22  ;;  %v2092_v57 = vshrl.u32 %v4235_v55, 16 }
  0xb8   : > { %700 = vrot.lane.b32.xlu0 %v666_v60, %s3538_s23  ;;  %v1291_v37 = vsel %vm708_vm3, %v3499_v30, %v1179_v59  ;;  %v582_v59 = vsel %vm402_vm1, %v577_v32, %v581_v35  ;;  %v2096_v60 = vrot.slane %v2094_v14, 1  ;;  %v3502_v32 = vld [vmem:[%s3589_s22 + $0xc] sm:$0xff]   ;;  %v3503_v14 = vld [vmem:[%s3589_s22] sm:$0xff]  }
  0xb9   : > { %702 = vrot.lane.b32.xlu1 %v669_v33, %s3538_s23  ;;  %v674_v33 = vrot.slane %v4214_v46, 1  ;;  %v2080_v46 = vshrl.u32 %v4243_v25, 16 }
  0xba   : > { %v1257_v16 = vpop.permute.xlu0 %1256  ;;  %v2097_v15 = vor.u32 %v2096_v60, %v2092_v57 }
  0xbb   : > { %v1161_v17 = vpop.permute.xlu1 %1160  ;;  %v1321_v26 = vsel %vm741_vm4, %v1289_v7, %v1257_v16  ;;  %v675_v13 = vsel %vm627_vm0, %v673_v47, %v674_v33  ;;  %v2101_v7 = vrot.slane %v2099_v63, 1  ;;  %v2085_v21 = vor.u32 %v2084_v54, %v2080_v46 }
  0xbc   : > { %3282 = vmatprep.mubr.msk.bf16.mxu1 %vm1332_vm5, %v1321_v26  ;;  %2127 = vrot.lane.b32.xlu0 %v2066_v18, %s3539_s24  ;;  %v1273_v1 = vsel %vm708_vm3, %v3500_v0, %v1161_v17  ;;  %v672_v18 = vsel %vm627_vm0, %v670_v48, %v671_v56  ;;  %v3505_v56 = vld [vmem:[%s3589_s22 + $0x18] sm:$0xff]  }
  0xbd   : > { %2129 = vrot.lane.b32.xlu1 %v2078_v8, %s3539_s24  ;;  %v2087_v8 = vshll.u32 %v4258_v42, 16  ;;  %v2102_v26 = vsel %vm402_vm1, %v2097_v15, %v2101_v7  ;;  %v3508_v7 = vld [vmem:[%s3589_s22 + $0x3c] sm:$0xff]  }
  0xbe   : > { %v1259_v38 = vpop.permute.xlu0 %1258 }
  0xbf   : > { %v1163_v39 = vpop.permute.xlu1 %1162  ;;  %v1323_v44 = vsel %vm741_vm4, %v1291_v37, %v1259_v38  ;;  %v2089_v22 = vrot.slane %v2087_v8, 1 }
  0xc0   : > { %3283 = vmatmul.mubr.msk.bf16.gmra.mxu1 %vm1332_vm5, %v1323_v44  ;;  %2207 = vrot.lane.b32.xlu0 %v2173_v41, %s3538_s23  ;;  %v1275_v3 = vsel %vm708_vm3, %v3501_v2, %v1163_v39  ;;  %v2178_v41 = vrot.slane %v4258_v42, 1  ;;  %v2182_v44 = vsel %vm627_vm0, %v2180_v28, %v2181_v23  ;;  %v3504_v42 = vld [vmem:[%s3589_s22 + $0x24] sm:$0xff]  }
  0xc1   : > { %2209 = vrot.lane.b32.xlu1 %v2176_v31, %s3538_s23  ;;  %v2177_v31 = vrot.slane %v4243_v25, 1  ;;  %v2090_v39 = vsel %vm402_vm1, %v2085_v21, %v2089_v22  ;;  %v3506_v2 = vld [vmem:[%s3589_s22 + $0x24] sm:$0xff]  }
  0xc2   : > { %v1241_v6 = vpop.permute.xlu0 %1240 }
  0xc3   : > { %v1243_v58 = vpop.permute.xlu1 %1242  ;;  %v1305_v9 = vsel %vm741_vm4, %v1273_v1, %v1241_v6  ;;  %v3507_v6 = vld [vmem:[%s3589_s22 + $0x18] sm:$0xff]  }
  0xc4   : > { %v1307_v11 = vsel %vm741_vm4, %v1275_v3, %v1243_v58  ;;  %3266 = vmatprep.mubr.msk.bf16.mxu0 %vm1332_vm5, %v1305_v9  ;;  %623 = vrot.lane.b32.xlu0 %v582_v59, %s3539_s24 }
  0xc5   : > { %625 = vrot.lane.b32.xlu1 %v594_v50, %s3539_s24  ;;  %3267 = vmatmul.mubr.msk.bf16.gmra.mxu0 %vm1332_vm5, %v1307_v11  ;;  %v2179_v50 = vsel %vm627_vm0, %v2177_v31, %v2178_v41 }
  0xc6   : > { %v596_v17 = vpop.permute.xlu0 %595 }
  0xc7   : > { %v598_v16 = vpop.permute.xlu1 %597  ;;  %v710_v30 = vsel %vm708_vm3, %v3503_v14, %v596_v17  ;;  %v3509_v17 = vld [vmem:[%s3589_s22 + $0x30] sm:$0xff]  }
  0xc8   : > { %704 = vrot.lane.b32.xlu0 %v672_v18, %s3538_s23  ;;  %v712_v35 = vsel %vm708_vm3, %v3502_v32, %v598_v16  ;;  %v3510_v32 = vld [vmem:[%s3589_s22 + $0x3c] sm:$0xff]   ;;  %v3511_v14 = vld [vmem:[%s3589_s22 + $0x30] sm:$0xff]  }
  0xc9   : > { %706 = vrot.lane.b32.xlu1 %v675_v13, %s3538_s23 }
  0xca   : > { %v677_v38 = vpop.permute.xlu0 %676 }
  0xcb   : > { %v679_v37 = vpop.permute.xlu1 %678  ;;  %v743_v36 = vsel %vm741_vm4, %v710_v30, %v677_v38 }
  0xcc   : > { %v745_v43 = vsel %vm741_vm4, %v712_v35, %v679_v37  ;;  %3288 = vmatprep.mubr.msk.bf16.mxu1 %vm1332_vm5, %v743_v36  ;;  %2131 = vrot.lane.b32.xlu0 %v2090_v39, %s3539_s24 }
  0xcd   : > { %2133 = vrot.lane.b32.xlu1 %v2102_v26, %s3539_s24  ;;  %3289 = vmatmul.mubr.msk.bf16.vlgmr.msra.gmra.mxu1 %vm1332_vm5, %v745_v43 }
  0xce   : > { %v2104_v33 = vpop.permute.xlu0 %2103 }
  0xcf   : > { %v2106_v47 = vpop.permute.xlu1 %2105  ;;  %v2216_v57 = vsel %vm708_vm3, %v3505_v56, %v2104_v33  ;;  %v3513_v33 = vld [vmem:[%s3589_s22 + $0x48] sm:$0xff]  }
  0xd0   : > { %2211 = vrot.lane.b32.xlu0 %v2179_v50, %s3538_s23  ;;  %v2218_v48 = vsel %vm708_vm3, %v3504_v42, %v2106_v47 }
  0xd1   : > { %2213 = vrot.lane.b32.xlu1 %v2182_v44, %s3538_s23  ;;  %v3512_v44 = vld [vmem:[%s3589_s22 + $0x54] sm:$0xff]  }
  0xd2   : > { %v2184_v60 = vpop.permute.xlu0 %2183 }
  0xd3   : > { %v2186_v59 = vpop.permute.xlu1 %2185  ;;  %v2248_v46 = vsel %vm741_vm4, %v2216_v57, %v2184_v60 }
  0xd4   : > { %v2250_v63 = vsel %vm741_vm4, %v2218_v48, %v2186_v59  ;;  %3322 = vmatprep.mubr.msk.bf16.mxu0 %vm1332_vm5, %v2248_v46 }
  0xd5   : > { %3323 = vmatmul.mubr.msk.bf16.vlgmr.msra.gmra.mxu0 %vm1332_vm5, %v2250_v63 }
  0xd6   : > { %v600_v1 = vpop.permute.xlu0 %599 }
  0xd7   : > { %v602_v0 = vpop.permute.xlu1 %601  ;;  %v714_v58 = vsel %vm708_vm3, %v3507_v6, %v600_v1 }
  0xd8   : > { %v716_v3 = vsel %vm708_vm3, %v3506_v2, %v602_v0 }
  0xda   : > { %v681_v8 = vpop.permute.xlu0 %680 }
  0xdb   : > { %v683_v54 = vpop.permute.xlu1 %682  ;;  %v747_v11 = vsel %vm741_vm4, %v714_v58, %v681_v8 }
  0xdc   : > { %v749_v9 = vsel %vm741_vm4, %v716_v3, %v683_v54  ;;  %3292 = vmatprep.mubr.msk.bf16.mxu1 %vm1332_vm5, %v747_v11 }
  0xdd   : > { %3293 = vmatmul.mubr.msk.bf16.gmra.mxu1 %vm1332_vm5, %v749_v9 }
  0xde   : > { %v2108_v15 = vpop.permute.xlu0 %2107 }
  0xdf   : > { %v2110_v13 = vpop.permute.xlu1 %2109  ;;  %v2220_v18 = vsel %vm708_vm3, %v3509_v17, %v2108_v15 }
  0xe0   : > { %v2222_v16 = vsel %vm708_vm3, %v3508_v7, %v2110_v13 }
  0xe2   : > { %v2188_v22 = vpop.permute.xlu0 %2187 }
  0xe3   : > { %v2190_v21 = vpop.permute.xlu1 %2189  ;;  %v2252_v28 = vsel %vm741_vm4, %v2220_v18, %v2188_v22 }
  0xe4   : > { %v2254_v26 = vsel %vm741_vm4, %v2222_v16, %v2190_v21  ;;  %3326 = vmatprep.mubr.msk.bf16.mxu0 %vm1332_vm5, %v2252_v28 }
  0xe5   : > { %3327 = vmatmul.mubr.msk.bf16.gmra.mxu0 %vm1332_vm5, %v2254_v26 }
  0xe6   : > { %v604_v31 = vpop.permute.xlu0 %603 }
  0xe7   : > { %v606_v23 = vpop.permute.xlu1 %605  ;;  %v718_v30 = vsel %vm708_vm3, %v3511_v14, %v604_v31 }
  0xe8   : > { %v720_v35 = vsel %vm708_vm3, %v3510_v32, %v606_v23 }
  0xea   : > { %v685_v38 = vpop.permute.xlu0 %684 }
  0xeb   : > { %v687_v37 = vpop.permute.xlu1 %686  ;;  %v751_v41 = vsel %vm741_vm4, %v718_v30, %v685_v38 }
  0xec   : > { %v753_v39 = vsel %vm741_vm4, %v720_v35, %v687_v37  ;;  %3296 = vmatprep.mubr.msk.bf16.mxu1 %vm1332_vm5, %v751_v41 }
  0xed   : > { %3297 = vmatmul.mubr.msk.bf16.gmra.mxu1 %vm1332_vm5, %v753_v39 }
  0xee   : > { %v2112_v36 = vpop.permute.xlu0 %2111 }
  0xef   : > { %v2114_v43 = vpop.permute.xlu1 %2113  ;;  %v2224_v50 = vsel %vm708_vm3, %v3513_v33, %v2112_v36 }
  0xf0   : > { %v2226_v47 = vsel %vm708_vm3, %v3512_v44, %v2114_v43 }
  0xf2   : > { %v2192_v48 = vpop.permute.xlu0 %2191 }
  0xf3   : > { %v2194_v42 = vpop.permute.xlu1 %2193  ;;  %v2256_v57 = vsel %vm741_vm4, %v2224_v50, %v2192_v48 }
  0xf4   : > { %v2258_v56 = vsel %vm741_vm4, %v2226_v47, %v2194_v42  ;;  %3330 = vmatprep.mubr.msk.bf16.mxu0 %vm1332_vm5, %v2256_v57 }
  0xf5   : > { %3331 = vmatmul.mubr.msk.bf16.gmra.mxu0 %vm1332_vm5, %v2258_v56 }
  0xf6   : > { %v608_v60 = vpop.permute.xlu0 %607 }
  0xf7   : > { %v610_v59 = vpop.permute.xlu1 %609  ;;  %v722_v46 = vsel %vm708_vm3, %v3920_v5, %v608_v60 }
  0xf8   : > { %v724_v63 = vsel %vm708_vm3, %v3911_v61, %v610_v59 }
  0xfa   : > { %v689_v1 = vpop.permute.xlu0 %688 }
  0xfb   : > { %v691_v0 = vpop.permute.xlu1 %690  ;;  %v755_v3 = vsel %vm741_vm4, %v722_v46, %v689_v1 }
  0xfc   : > { %v757_v2 = vsel %vm741_vm4, %v724_v63, %v691_v0  ;;  %3300 = vmatprep.mubr.msk.bf16.mxu1 %vm1332_vm5, %v755_v3 }
  0xfd   : > { %3301 = vmatmul.mubr.msk.bf16.gmra.mxu1 %vm1332_vm5, %v757_v2 }
  0xfe   : > { %v2116_v58 = vpop.permute.xlu0 %2115 }
  0xff   : > { %v2118_v6 = vpop.permute.xlu1 %2117  ;;  %v2228_v61 = vsel %vm708_vm3, %v3945_v29, %v2116_v58 }
 0x100   : > { %v2230_v54 = vsel %vm708_vm3, %v3940_v24, %v2118_v6 }
 0x102   : > { %v2196_v5 = vpop.permute.xlu0 %2195 }
 0x103   : > { %v2198_v8 = vpop.permute.xlu1 %2197  ;;  %v2260_v11 = vsel %vm741_vm4, %v2228_v61, %v2196_v5 }
 0x104   : > { %v2262_v9 = vsel %vm741_vm4, %v2230_v54, %v2198_v8  ;;  %3334 = vmatprep.mubr.msk.bf16.mxu0 %vm1332_vm5, %v2260_v11 }
 0x105   : > { %3335 = vmatmul.mubr.msk.bf16.gmra.mxu0 %vm1332_vm5, %v2262_v9 }
 0x106   : > { %v612_v15 = vpop.permute.xlu0 %611 }
 0x107   : > { %v614_v13 = vpop.permute.xlu1 %613  ;;  %v726_v24 = vsel %vm708_vm3, %v3971_v53, %v612_v15 }
 0x108   : > { %v728_v7 = vsel %vm708_vm3, %v3962_v45, %v614_v13 }
 0x10a   : > { %v693_v29 = vpop.permute.xlu0 %692 }
 0x10b   : > { %v695_v16 = vpop.permute.xlu1 %694  ;;  %v759_v18 = vsel %vm741_vm4, %v726_v24, %v693_v29 }
 0x10c   : > { %v761_v17 = vsel %vm741_vm4, %v728_v7, %v695_v16  ;;  %3304 = vmatprep.mubr.msk.bf16.mxu1 %vm1332_vm5, %v759_v18 }
 0x10d   : > { %3305 = vmatmul.mubr.msk.bf16.gmra.mxu1 %vm1332_vm5, %v761_v17 }
 0x10e   : > { %v2120_v22 = vpop.permute.xlu0 %2119 }
 0x10f   : > { %v2122_v21 = vpop.permute.xlu1 %2121  ;;  %v2232_v45 = vsel %vm708_vm3, %v4002_v19, %v2120_v22 }
 0x110   : > { %v2234_v26 = vsel %vm708_vm3, %v3996_v12, %v2122_v21 }
 0x112   : > { %v2200_v23 = vpop.permute.xlu0 %2199 }
 0x113   : > { %v2202_v28 = vpop.permute.xlu1 %2201  ;;  %v2264_v31 = vsel %vm741_vm4, %v2232_v45, %v2200_v23 }
 0x114   : > { %v2266_v53 = vsel %vm741_vm4, %v2234_v26, %v2202_v28  ;;  %3338 = vmatprep.mubr.msk.bf16.mxu0 %vm1332_vm5, %v2264_v31 }
 0x115   : > { %3339 = vmatmul.mubr.msk.bf16.gmra.mxu0 %vm1332_vm5, %v2266_v53 }
 0x116   : > { %v616_v35 = vpop.permute.xlu0 %615 }
 0x117   : > { %v618_v32 = vpop.permute.xlu1 %617  ;;  %v730_v12 = vsel %vm708_vm3, %v4041_v52, %v616_v35 }
 0x118   : > { %v732_v14 = vsel %vm708_vm3, %v4038_v51, %v618_v32 }
 0x11a   : > { %v697_v37 = vpop.permute.xlu0 %696 }
 0x11b   : > { %v699_v30 = vpop.permute.xlu1 %698  ;;  %v763_v38 = vsel %vm741_vm4, %v730_v12, %v697_v37 }
 0x11c   : > { %v765_v19 = vsel %vm741_vm4, %v732_v14, %v699_v30  ;;  %3308 = vmatprep.mubr.msk.bf16.mxu1 %vm1332_vm5, %v763_v38 }
 0x11d   : > { %3309 = vmatmul.mubr.msk.bf16.gmra.mxu1 %vm1332_vm5, %v765_v19 }
 0x11e   : > { %v2124_v41 = vpop.permute.xlu0 %2123 }
 0x11f   : > { %v2126_v39 = vpop.permute.xlu1 %2125  ;;  %v2236_v51 = vsel %vm708_vm3, %v4091_v40, %v2124_v41 }
 0x120   : > { %v2238_v43 = vsel %vm708_vm3, %v4083_v20, %v2126_v39 }
 0x122   : > { %v2204_v44 = vpop.permute.xlu0 %2203 }
 0x123   : > { %v2206_v36 = vpop.permute.xlu1 %2205  ;;  %v2268_v47 = vsel %vm741_vm4, %v2236_v51, %v2204_v44 }
 0x124   : > { %v2270_v52 = vsel %vm741_vm4, %v2238_v43, %v2206_v36  ;;  %3342 = vmatprep.mubr.msk.bf16.mxu0 %vm1332_vm5, %v2268_v47 }
 0x125   : > { %3343 = vmatmul.mubr.msk.bf16.gmra.mxu0 %vm1332_vm5, %v2270_v52 }
 0x126   : > { %v620_v50 = vpop.permute.xlu0 %619 }
 0x127   : > { %v622_v33 = vpop.permute.xlu1 %621  ;;  %v734_v20 = vsel %vm708_vm3, %v4126_v10, %v620_v50 }
 0x128   : > { %v736_v42 = vsel %vm708_vm3, %v4119_v4, %v622_v33 }
 0x12a   : > { %v701_v56 = vpop.permute.xlu0 %700 }
 0x12b   : > { %v703_v48 = vpop.permute.xlu1 %702  ;;  %v767_v57 = vsel %vm741_vm4, %v734_v20, %v701_v56 }
 0x12c   : > { %v769_v40 = vsel %vm741_vm4, %v736_v42, %v703_v48  ;;  %3312 = vmatprep.mubr.msk.bf16.mxu1 %vm1332_vm5, %v767_v57 }
 0x12d   : > { %3313 = vmatmul.mubr.msk.bf16.gmra.mxu1 %vm1332_vm5, %v769_v40  ;;  %v4488_v40 = vld [vmem:[%s4668_s2] ss:$0 sm:$0xff] }
 0x12e   : > { %v2128_v60 = vpop.permute.xlu0 %2127 }
 0x12f   : > { %v2130_v59 = vpop.permute.xlu1 %2129  ;;  %v2240_v4 = vsel %vm708_vm3, %v4167_v62, %v2128_v60  ;;  %v4493_v60 = vld [vmem:[%s4669_s3] ss:$0 sm:$0xff] }
 0x130   : > { %v2242_v63 = vsel %vm708_vm3, %v4159_v49, %v2130_v59 }
 0x132   : > { %v2208_v0 = vpop.permute.xlu0 %2207 }
 0x133   : > { %v2210_v46 = vpop.permute.xlu1 %2209  ;;  %v2272_v1 = vsel %vm741_vm4, %v2240_v4, %v2208_v0 }
 0x134   : > { %v2274_v10 = vsel %vm741_vm4, %v2242_v63, %v2210_v46  ;;  %3346 = vmatprep.mubr.msk.bf16.mxu0 %vm1332_vm5, %v2272_v1 }
 0x135   : > { %3347 = vmatmul.mubr.msk.bf16.gmra.mxu0 %vm1332_vm5, %v2274_v10 }
 0x136   : > { %v624_v3 = vpop.permute.xlu0 %623 }
 0x137   : > { %v626_v2 = vpop.permute.xlu1 %625  ;;  %v738_v49 = vsel %vm708_vm3, %v4202_v34, %v624_v3 }
 0x138   : > { %v740_v6 = vsel %vm708_vm3, %v4195_v27, %v626_v2 }
 0x13a   : > { %v705_v54 = vpop.permute.xlu0 %704 }
 0x13b   : > { %v707_v58 = vpop.permute.xlu1 %706  ;;  %v771_v61 = vsel %vm741_vm4, %v738_v49, %v705_v54 }
 0x13c   : > { %v773_v62 = vsel %vm741_vm4, %v740_v6, %v707_v58  ;;  %3316 = vmatprep.mubr.msk.bf16.mxu1 %vm1332_vm5, %v771_v61 }
 0x13d   : > { %3317 = vmatmul.mubr.msk.bf16.gmra.mxu1 %vm1332_vm5, %v773_v62 }
 0x13e   : > { %v2132_v5 = vpop.permute.xlu0 %2131 }
 0x13f   : > { %v2134_v8 = vpop.permute.xlu1 %2133  ;;  %v2244_v27 = vsel %vm708_vm3, %v4243_v25, %v2132_v5 }
 0x140   : > { %v2246_v9 = vsel %vm708_vm3, %v4235_v55, %v2134_v8 }
 0x142   : > { %v2212_v13 = vpop.permute.xlu0 %2211 }
 0x143   : > { %v2214_v11 = vpop.permute.xlu1 %2213  ;;  %v2276_v15 = vsel %vm741_vm4, %v2244_v27, %v2212_v13 }
 0x144   : > { %v2278_v34 = vsel %vm741_vm4, %v2246_v9, %v2214_v11  ;;  %3350 = vmatprep.mubr.msk.bf16.mxu0 %vm1332_vm5, %v2276_v15 }
 0x145   : > { %3351 = vmatmul.mubr.msk.bf16.gmra.mxu0 %vm1332_vm5, %v2278_v34 }
 0x155   : > { %v4429_v7 = vpop.f32.mrf.mxu1 }
 0x156   : > { %v3256_v16 = vpop.f32.mrf.mxu0 }
 0x157   : > { %v4431_v24 = vpop.f32.mrf.mxu1 }
 0x158   : > { %v1403_v55 = vpop.f32.mrf.mxu0 }
 0x159   : > { %v4433_v29 = vpop.f32.mrf.mxu1 }
 0x15a   : > { %v3257_v18 = vpop.f32.mrf.mxu0 }
 0x15b   : > { %v4435_v17 = vpop.f32.mrf.mxu1 }
 0x15c   : > { %v1406_v22 = vpop.f32.mrf.mxu0 }
 0x160   : > { %v4437_v25 = vpop.f32.mrf.mxu1 }
 0x162   : > { %v4439_v21 = vpop.f32.mrf.mxu1 }
 0x164   : > { %v4443_v28 = vpop.f32.mrf.mxu1 }
 0x165   : > { %v4441_v26 = vpop.f32.mrf.mxu0 }
 0x166   : > { %v4447_v53 = vpop.f32.mrf.mxu1 }
 0x167   : > { %v4445_v45 = vpop.f32.mrf.mxu0 }
 0x169   : > { %v4451_v31 = vpop.f32.mrf.mxu0 }
 0x16b   : > { %v4455_v35 = vpop.f32.mrf.mxu0 }
 0x170   : > { %v4449_v23 = vpop.f32.mrf.mxu1 }
 0x172   : > { %v4453_v32 = vpop.f32.mrf.mxu1 }
 0x174   : > { %v4459_v30 = vpop.f32.mrf.mxu1 }
 0x175   : > { %v4457_v14 = vpop.f32.mrf.mxu0 }
 0x176   : > { %v4463_v19 = vpop.f32.mrf.mxu1 }
 0x177   : > { %v4461_v12 = vpop.f32.mrf.mxu0 }
 0x179   : > { %v4467_v38 = vpop.f32.mrf.mxu0 }
 0x17b   : > { %v4471_v41 = vpop.f32.mrf.mxu0 }
 0x180   : > { %v4465_v37 = vpop.f32.mrf.mxu1 }
 0x182   : > { %v4469_v39 = vpop.f32.mrf.mxu1 }
 0x184   : > { %v4473_v43 = vpop.f32.mrf.mxu1 }
 0x185   : > { %v4475_v36 = vpop.f32.mrf.mxu0 }
 0x186   : > { %v4477_v51 = vpop.f32.mrf.mxu1 }
 0x187   : > { %v4479_v52 = vpop.f32.mrf.mxu0 }
 0x189   : > { %v4481_v47 = vpop.f32.mrf.mxu0 }
 0x18b   : > { %v4483_v50 = vpop.f32.mrf.mxu0 }
 0x18d   : > { %v3290_v44 = vpop.f32.mrf.mxu1 }
 0x18e   : > { %v1613_v48 = vadd.f32 %v3290_v44, %v3256_v16 }
 0x18f   : > { %v1604_v33 = vpop.f32.mrf.mxu1 }
 0x190   : > { %v1605_v56 = vadd.f32 %v1604_v33, %v1403_v55 }
 0x191   : > { %v3291_v42 = vpop.f32.mrf.mxu1 }
 0x192   : > { %v1616_v46 = vadd.f32 %v3291_v42, %v3257_v18 }
 0x193   : > { %v1607_v59 = vpop.f32.mrf.mxu1 }
 0x194   : > { %v1608_v1 = vadd.f32 %v1607_v59, %v1406_v22 }
 0x195   : > { %v3324_v20 = vpop.f32.mrf.mxu0 }
 0x196   : > { %v2485_v57 = vadd.f32 %v3324_v20, %v1613_v48 }
 0x197   : > { %v2356_v63 = vpop.f32.mrf.mxu0 }
 0x198   : > { %v2524_v4 = vmul.f32 %v4488_v40, %v2485_v57  ;;  %v2483_v10 = vadd.f32 %v2356_v63, %v1605_v56 }
 0x199   : > { %v3325_v0 = vpop.f32.mrf.mxu0 }
 0x19a   : > { %v2563_v2 = vadd.f32 %v4493_v60, %v2524_v4  ;;  %v2522_v3 = vmul.f32 %v4488_v40, %v2483_v10  ;;  %v2486_v6 = vadd.f32 %v3325_v0, %v1616_v46 }
 0x19b   : > { %v2359_v58 = vpop.f32.mrf.mxu0 }
 0x19c   : > { %v2595_v49 = vmax.f32 %v2563_v2, 0.0  ;;  %v2561_v62 = vadd.f32 %v4493_v60, %v2522_v3  ;;  %v2525_v54 = vmul.f32 %v4488_v40, %v2486_v6  ;;  %v2484_v61 = vadd.f32 %v2359_v58, %v1608_v1 }
 0x19d   : > { %v3294_v8 = vpop.f32.mrf.mxu1 }
 0x19e   : > { %v3171_v5 = vpack.c.bf16 %v2595_v49, %v2595_v49  ;;  %v2593_v9 = vmax.f32 %v2561_v62, 0.0  ;;  %v2564_v11 = vadd.f32 %v4493_v60, %v2525_v54  ;;  %v2523_v27 = vmul.f32 %v4488_v40, %v2484_v61 }
 0x19f   : > { %v1620_v34 = vpop.f32.mrf.mxu1  ;;  %v1629_v33 = vadd.f32 %v3294_v8, %v4441_v26 }
 0x1a0   : > { %2756 = vst.msk [vmem:[%s4504_s12 + $0x8] sm:$0xf] %vm2753_vm6, %v3171_v5  ;;  %v3169_v13 = vpack.c.bf16 %v2593_v9, %v2593_v9  ;;  %v2596_v15 = vmax.f32 %v2564_v11, 0.0  ;;  %v2562_v16 = vadd.f32 %v4493_v60, %v2523_v27  ;;  %v1621_v48 = vadd.f32 %v1620_v34, %v4445_v45 }
 0x1a1   : > { %v3295_v22 = vpop.f32.mrf.mxu1 }
 0x1a2   : > { %2754 = vst.msk [vmem:[%s4504_s12] sm:$0xf] %vm2753_vm6, %v3169_v13  ;;  %v3172_v55 = vpack.c.bf16 %v2596_v15, %v2596_v15  ;;  %v2594_v18 = vmax.f32 %v2562_v16, 0.0  ;;  %v1632_v59 = vadd.f32 %v3295_v22, %v4451_v31 }
 0x1a3   : > { %v1623_v56 = vpop.f32.mrf.mxu1 }
 0x1a4   : > { %2757 = vst.msk [vmem:[%s4504_s12 + $0xc] sm:$0xf] %vm2753_vm6, %v3172_v55  ;;  %v3170_v44 = vpack.c.bf16 %v2594_v18, %v2594_v18  ;;  %v1624_v10 = vadd.f32 %v1623_v56, %v4455_v35 }
 0x1a5   : > { %v3328_v42 = vpop.f32.mrf.mxu0 }
 0x1a6   : > { %2755 = vst.msk [vmem:[%s4504_s12 + $0x4] sm:$0xf] %vm2753_vm6, %v3170_v44  ;;  %v2489_v20 = vadd.f32 %v3328_v42, %v1629_v33 }
 0x1a7   : > { %v2372_v57 = vpop.f32.mrf.mxu0 }
 0x1a8   : > { %v2528_v63 = vmul.f32 %v4488_v40, %v2489_v20  ;;  %v2487_v46 = vadd.f32 %v2372_v57, %v1621_v48 }
 0x1a9   : > { %v3329_v4 = vpop.f32.mrf.mxu0 }
 0x1aa   : > { %v2567_v0 = vadd.f32 %v4493_v60, %v2528_v63  ;;  %v2526_v26 = vmul.f32 %v4488_v40, %v2487_v46  ;;  %v2490_v1 = vadd.f32 %v3329_v4, %v1632_v59 }
 0x1ab   : > { %v2375_v2 = vpop.f32.mrf.mxu0 }
 0x1ac   : > { %v2599_v45 = vmax.f32 %v2567_v0, 0.0  ;;  %v2565_v3 = vadd.f32 %v4493_v60, %v2526_v26  ;;  %v2529_v6 = vmul.f32 %v4488_v40, %v2490_v1  ;;  %v2488_v31 = vadd.f32 %v2375_v2, %v1624_v10 }
 0x1ad   : > { %v3298_v58 = vpop.f32.mrf.mxu1 }
 0x1ae   : > { %v3175_v49 = vpack.c.bf16 %v2599_v45, %v2599_v45  ;;  %v2597_v62 = vmax.f32 %v2565_v3, 0.0  ;;  %v2568_v35 = vadd.f32 %v4493_v60, %v2529_v6  ;;  %v2527_v54 = vmul.f32 %v4488_v40, %v2488_v31 }
 0x1af   : > { %v1636_v61 = vpop.f32.mrf.mxu1  ;;  %v1645_v15 = vadd.f32 %v3298_v58, %v4457_v14 }
 0x1b0   : > { %2760 = vst.msk [vmem:[%s4504_s12 + $0x18] sm:$0xf] %vm2753_vm6, %v3175_v49  ;;  %v3173_v8 = vpack.c.bf16 %v2597_v62, %v2597_v62  ;;  %v2600_v5 = vmax.f32 %v2568_v35, 0.0  ;;  %v2566_v9 = vadd.f32 %v4493_v60, %v2527_v54  ;;  %v1637_v55 = vadd.f32 %v1636_v61, %v4461_v12 }
 0x1b1   : > { %v3299_v34 = vpop.f32.mrf.mxu1 }
 0x1b2   : > { %2758 = vst.msk [vmem:[%s4504_s12 + $0x10] sm:$0xf] %vm2753_vm6, %v3173_v8  ;;  %v3176_v11 = vpack.c.bf16 %v2600_v5, %v2600_v5  ;;  %v2598_v27 = vmax.f32 %v2566_v9, 0.0  ;;  %v1648_v33 = vadd.f32 %v3299_v34, %v4467_v38 }
 0x1b3   : > { %v1639_v22 = vpop.f32.mrf.mxu1 }
 0x1b4   : > { %2761 = vst.msk [vmem:[%s4504_s12 + $0x1c] sm:$0xf] %vm2753_vm6, %v3176_v11  ;;  %v3174_v13 = vpack.c.bf16 %v2598_v27, %v2598_v27  ;;  %v1640_v56 = vadd.f32 %v1639_v22, %v4471_v41 }
 0x1b5   : > { %v3332_v16 = vpop.f32.mrf.mxu0 }
 0x1b6   : > { %2759 = vst.msk [vmem:[%s4504_s12 + $0x14] sm:$0xf] %vm2753_vm6, %v3174_v13  ;;  %v2493_v18 = vadd.f32 %v3332_v16, %v1645_v15 }
 0x1b7   : > { %v2388_v44 = vpop.f32.mrf.mxu0 }
 0x1b8   : > { %v2532_v42 = vmul.f32 %v4488_v40, %v2493_v18  ;;  %v2491_v48 = vadd.f32 %v2388_v44, %v1637_v55 }
 0x1b9   : > { %v3333_v20 = vpop.f32.mrf.mxu0 }
 0x1ba   : > { %v2571_v57 = vadd.f32 %v4493_v60, %v2532_v42  ;;  %v2530_v14 = vmul.f32 %v4488_v40, %v2491_v48  ;;  %v2494_v59 = vadd.f32 %v3333_v20, %v1648_v33 }
 0x1bb   : > { %v2391_v63 = vpop.f32.mrf.mxu0 }
 0x1bc   : > { %v2603_v12 = vmax.f32 %v2571_v57, 0.0  ;;  %v2569_v46 = vadd.f32 %v4493_v60, %v2530_v14  ;;  %v2533_v4 = vmul.f32 %v4488_v40, %v2494_v59  ;;  %v2492_v38 = vadd.f32 %v2391_v63, %v1640_v56 }
 0x1bd   : > { %v3302_v10 = vpop.f32.mrf.mxu1 }
 0x1be   : > { %v3179_v0 = vpack.c.bf16 %v2603_v12, %v2603_v12  ;;  %v2601_v26 = vmax.f32 %v2569_v46, 0.0  ;;  %v2572_v41 = vadd.f32 %v4493_v60, %v2533_v4  ;;  %v2531_v1 = vmul.f32 %v4488_v40, %v2492_v38 }
 0x1bf   : > { %v1652_v2 = vpop.f32.mrf.mxu1  ;;  %v1661_v35 = vadd.f32 %v3302_v10, %v4475_v36 }
 0x1c0   : > { %2764 = vst.msk [vmem:[%s4504_s12 + $0x28] sm:$0xf] %vm2753_vm6, %v3179_v0  ;;  %v3177_v45 = vpack.c.bf16 %v2601_v26, %v2601_v26  ;;  %v2604_v3 = vmax.f32 %v2572_v41, 0.0  ;;  %v2570_v6 = vadd.f32 %v4493_v60, %v2531_v1  ;;  %v1653_v61 = vadd.f32 %v1652_v2, %v4479_v52 }
 0x1c1   : > { %v3303_v49 = vpop.f32.mrf.mxu1 }
 0x1c2   : > { %2762 = vst.msk [vmem:[%s4504_s12 + $0x20] sm:$0xf] %vm2753_vm6, %v3177_v45  ;;  %v3180_v31 = vpack.c.bf16 %v2604_v3, %v2604_v3  ;;  %v2602_v58 = vmax.f32 %v2570_v6, 0.0  ;;  %v1664_v11 = vadd.f32 %v3303_v49, %v4481_v47 }
 0x1c3   : > { %v1655_v5 = vpop.f32.mrf.mxu1 }
 0x1c4   : > { %2765 = vst.msk [vmem:[%s4504_s12 + $0x2c] sm:$0xf] %vm2753_vm6, %v3180_v31  ;;  %v3178_v62 = vpack.c.bf16 %v2602_v58, %v2602_v58  ;;  %v1656_v15 = vadd.f32 %v1655_v5, %v4483_v50 }
 0x1c5   : > { %v3336_v54 = vpop.f32.mrf.mxu0 }
 0x1c6   : > { %2763 = vst.msk [vmem:[%s4504_s12 + $0x24] sm:$0xf] %vm2753_vm6, %v3178_v62  ;;  %v2497_v8 = vadd.f32 %v3336_v54, %v1661_v35 }
 0x1c7   : > { %v2404_v9 = vpop.f32.mrf.mxu0 }
 0x1c8   : > { %v2536_v27 = vmul.f32 %v4488_v40, %v2497_v8  ;;  %v2495_v34 = vadd.f32 %v2404_v9, %v1653_v61 }
 0x1c9   : > { %v3337_v13 = vpop.f32.mrf.mxu0 }
 0x1ca   : > { %v2575_v16 = vadd.f32 %v4493_v60, %v2536_v27  ;;  %v2534_v36 = vmul.f32 %v4488_v40, %v2495_v34  ;;  %v2498_v55 = vadd.f32 %v3337_v13, %v1664_v11 }
 0x1cb   : > { %v2407_v18 = vpop.f32.mrf.mxu0 }
 0x1cc   : > { %v2607_v52 = vmax.f32 %v2575_v16, 0.0  ;;  %v2573_v22 = vadd.f32 %v4493_v60, %v2534_v36  ;;  %v2537_v47 = vmul.f32 %v4488_v40, %v2498_v55  ;;  %v2496_v44 = vadd.f32 %v2407_v18, %v1656_v15 }
 0x1cd   : > { %v3306_v33 = vpop.f32.mrf.mxu1 }
 0x1ce   : > { %v3183_v42 = vpack.c.bf16 %v2607_v52, %v2607_v52  ;;  %v2605_v48 = vmax.f32 %v2573_v22, 0.0  ;;  %v2576_v50 = vadd.f32 %v4493_v60, %v2537_v47  ;;  %v2535_v20 = vmul.f32 %v4488_v40, %v2496_v44 }
 0x1cf   : > { %v1668_v59 = vpop.f32.mrf.mxu1  ;;  %v1677_v38 = vadd.f32 %v3306_v33, %v4429_v7 }
 0x1d0   : > { %2768 = vst.msk [vmem:[%s4504_s12 + $0x38] sm:$0xf] %vm2753_vm6, %v3183_v42  ;;  %v3181_v56 = vpack.c.bf16 %v2605_v48, %v2605_v48  ;;  %v2608_v57 = vmax.f32 %v2576_v50, 0.0  ;;  %v2574_v14 = vadd.f32 %v4493_v60, %v2535_v20  ;;  %v1669_v0 = vadd.f32 %v1668_v59, %v4431_v24 }
 0x1d1   : > { %v3307_v4 = vpop.f32.mrf.mxu1 }
 0x1d2   : > { %2766 = vst.msk [vmem:[%s4504_s12 + $0x30] sm:$0xf] %vm2753_vm6, %v3181_v56  ;;  %v3184_v63 = vpack.c.bf16 %v2608_v57, %v2608_v57  ;;  %v2606_v12 = vmax.f32 %v2574_v14, 0.0  ;;  %v1680_v2 = vadd.f32 %v3307_v4, %v4433_v29 }
 0x1d3   : > { %v1671_v41 = vpop.f32.mrf.mxu1 }
 0x1d4   : > { %2769 = vst.msk [vmem:[%s4504_s12 + $0x3c] sm:$0xf] %vm2753_vm6, %v3184_v63  ;;  %v3182_v46 = vpack.c.bf16 %v2606_v12, %v2606_v12  ;;  %v1672_v31 = vadd.f32 %v1671_v41, %v4435_v17 }
 0x1d5   : > { %v3340_v10 = vpop.f32.mrf.mxu0 }
 0x1d6   : > { %2767 = vst.msk [vmem:[%s4504_s12 + $0x34] sm:$0xf] %vm2753_vm6, %v3182_v46  ;;  %v2501_v26 = vadd.f32 %v3340_v10, %v1677_v38 }
 0x1d7   : > { %v2420_v1 = vpop.f32.mrf.mxu0 }
 0x1d8   : > { %v2540_v45 = vmul.f32 %v4488_v40, %v2501_v26  ;;  %v2499_v3 = vadd.f32 %v2420_v1, %v1669_v0 }
 0x1d9   : > { %v3341_v6 = vpop.f32.mrf.mxu0 }
 0x1da   : > { %v2579_v58 = vadd.f32 %v4493_v60, %v2540_v45  ;;  %v2538_v7 = vmul.f32 %v4488_v40, %v2499_v3  ;;  %v2502_v49 = vadd.f32 %v3341_v6, %v1680_v2 }
 0x1db   : > { %v2423_v62 = vpop.f32.mrf.mxu0 }
 0x1dc   : > { %v2611_v24 = vmax.f32 %v2579_v58, 0.0  ;;  %v2577_v35 = vadd.f32 %v4493_v60, %v2538_v7  ;;  %v2541_v54 = vmul.f32 %v4488_v40, %v2502_v49  ;;  %v2500_v29 = vadd.f32 %v2423_v62, %v1672_v31 }
 0x1dd   : > { %v3310_v61 = vpop.f32.mrf.mxu1 }
 0x1de   : > { %v3187_v8 = vpack.c.bf16 %v2611_v24, %v2611_v24  ;;  %v2609_v5 = vmax.f32 %v2577_v35, 0.0  ;;  %v2580_v17 = vadd.f32 %v4493_v60, %v2541_v54  ;;  %v2539_v9 = vmul.f32 %v4488_v40, %v2500_v29 }
 0x1df   : > { %v1684_v11 = vpop.f32.mrf.mxu1  ;;  %v1693_v18 = vadd.f32 %v3310_v61, %v4437_v25 }
 0x1e0   : > { %2772 = vst.msk [vmem:[%s4504_s12 + $0x48] sm:$0xf] %vm2753_vm6, %v3187_v8  ;;  %v3185_v27 = vpack.c.bf16 %v2609_v5, %v2609_v5  ;;  %v2612_v34 = vmax.f32 %v2580_v17, 0.0  ;;  %v2578_v13 = vadd.f32 %v4493_v60, %v2539_v9  ;;  %v1685_v22 = vadd.f32 %v1684_v11, %v4439_v21 }
 0x1e1   : > { %v3311_v36 = vpop.f32.mrf.mxu1 }
 0x1e2   : > { %2770 = vst.msk [vmem:[%s4504_s12 + $0x40] sm:$0xf] %vm2753_vm6, %v3185_v27  ;;  %v3188_v15 = vpack.c.bf16 %v2612_v34, %v2612_v34  ;;  %v2610_v16 = vmax.f32 %v2578_v13, 0.0  ;;  %v1696_v42 = vadd.f32 %v3311_v36, %v4443_v28 }
 0x1e3   : > { %v1687_v44 = vpop.f32.mrf.mxu1 }
 0x1e4   : > { %2773 = vst.msk [vmem:[%s4504_s12 + $0x4c] sm:$0xf] %vm2753_vm6, %v3188_v15  ;;  %v3186_v55 = vpack.c.bf16 %v2610_v16, %v2610_v16  ;;  %v1688_v56 = vadd.f32 %v1687_v44, %v4447_v53 }
 0x1e5   : > { %v3344_v52 = vpop.f32.mrf.mxu0 }
 0x1e6   : > { %2771 = vst.msk [vmem:[%s4504_s12 + $0x44] sm:$0xf] %vm2753_vm6, %v3186_v55  ;;  %v2505_v47 = vadd.f32 %v3344_v52, %v1693_v18 }
 0x1e7   : > { %v2436_v33 = vpop.f32.mrf.mxu0 }
 0x1e8   : > { %v2544_v48 = vmul.f32 %v4488_v40, %v2505_v47  ;;  %v2503_v50 = vadd.f32 %v2436_v33, %v1685_v22 }
 0x1e9   : > { %v3345_v20 = vpop.f32.mrf.mxu0 }
 0x1ea   : > { %v2583_v57 = vadd.f32 %v4493_v60, %v2544_v48  ;;  %v2542_v25 = vmul.f32 %v4488_v40, %v2503_v50  ;;  %v2506_v14 = vadd.f32 %v3345_v20, %v1696_v42 }
 0x1eb   : > { %v2439_v59 = vpop.f32.mrf.mxu0 }
 0x1ec   : > { %v2615_v21 = vmax.f32 %v2583_v57, 0.0  ;;  %v2581_v63 = vadd.f32 %v4493_v60, %v2542_v25  ;;  %v2545_v12 = vmul.f32 %v4488_v40, %v2506_v14  ;;  %v2504_v28 = vadd.f32 %v2439_v59, %v1688_v56 }
 0x1ed   : > { %v3314_v46 = vpop.f32.mrf.mxu1 }
 0x1ee   : > { %v3191_v4 = vpack.c.bf16 %v2615_v21, %v2615_v21  ;;  %v2613_v38 = vmax.f32 %v2581_v63, 0.0  ;;  %v2584_v53 = vadd.f32 %v4493_v60, %v2545_v12  ;;  %v2543_v10 = vmul.f32 %v4488_v40, %v2504_v28 }
 0x1ef   : > { %v1700_v0 = vpop.f32.mrf.mxu1  ;;  %v1709_v31 = vadd.f32 %v3314_v46, %v4449_v23 }
 0x1f0   : > { %2776 = vst.msk [vmem:[%s4504_s12 + $0x58] sm:$0xf] %vm2753_vm6, %v3191_v4  ;;  %v3189_v26 = vpack.c.bf16 %v2613_v38, %v2613_v38  ;;  %v2616_v41 = vmax.f32 %v2584_v53, 0.0  ;;  %v2582_v1 = vadd.f32 %v4493_v60, %v2543_v10  ;;  %v1701_v7 = vadd.f32 %v1700_v0, %v4453_v32 }
 0x1f1   : > { %v3315_v3 = vpop.f32.mrf.mxu1 }
 0x1f2   : > { %2774 = vst.msk [vmem:[%s4504_s12 + $0x50] sm:$0xf] %vm2753_vm6, %v3189_v26  ;;  %v3192_v2 = vpack.c.bf16 %v2616_v41, %v2616_v41  ;;  %v2614_v45 = vmax.f32 %v2582_v1, 0.0  ;;  %v1712_v35 = vadd.f32 %v3315_v3, %v4459_v30 }
 0x1f3   : > { %v1703_v62 = vpop.f32.mrf.mxu1 }
 0x1f4   : > { %2777 = vst.msk [vmem:[%s4504_s12 + $0x5c] sm:$0xf] %vm2753_vm6, %v3192_v2  ;;  %v3190_v6 = vpack.c.bf16 %v2614_v45, %v2614_v45  ;;  %v1704_v8 = vadd.f32 %v1703_v62, %v4463_v19 }
 0x1f5   : > { %v3348_v58 = vpop.f32.mrf.mxu0 }
 0x1f6   : > { %2775 = vst.msk [vmem:[%s4504_s12 + $0x54] sm:$0xf] %vm2753_vm6, %v3190_v6  ;;  %v2509_v49 = vadd.f32 %v3348_v58, %v1709_v31 }
 0x1f7   : > { %v2452_v24 = vpop.f32.mrf.mxu0 }
 0x1f8   : > { %v2548_v54 = vmul.f32 %v4488_v40, %v2509_v49  ;;  %v2507_v29 = vadd.f32 %v2452_v24, %v1701_v7 }
 0x1f9   : > { %v3349_v61 = vpop.f32.mrf.mxu0 }
 0x1fa   : > { %v2587_v5 = vadd.f32 %v4493_v60, %v2548_v54  ;;  %v2546_v23 = vmul.f32 %v4488_v40, %v2507_v29  ;;  %v2510_v17 = vadd.f32 %v3349_v61, %v1712_v35 }
 0x1fb   : > { %v2455_v9 = vpop.f32.mrf.mxu0 }
 0x1fc   : > { %v2619_v32 = vmax.f32 %v2587_v5, 0.0  ;;  %v2585_v11 = vadd.f32 %v4493_v60, %v2546_v23  ;;  %v2549_v27 = vmul.f32 %v4488_v40, %v2510_v17  ;;  %v2508_v30 = vadd.f32 %v2455_v9, %v1704_v8 }
 0x1fd   : > { %v3318_v34 = vpop.f32.mrf.mxu1 }
 0x1fe   : > { %v3195_v13 = vpack.c.bf16 %v2619_v32, %v2619_v32  ;;  %v2617_v15 = vmax.f32 %v2585_v11, 0.0  ;;  %v2588_v19 = vadd.f32 %v4493_v60, %v2549_v27  ;;  %v2547_v16 = vmul.f32 %v4488_v40, %v2508_v30 }
 0x1ff   : > { %v1716_v36 = vpop.f32.mrf.mxu1  ;;  %v1725_v42 = vadd.f32 %v3318_v34, %v4465_v37 }
 0x200   : > { %2780 = vst.msk [vmem:[%s4504_s12 + $0x68] sm:$0xf] %vm2753_vm6, %v3195_v13  ;;  %v3193_v55 = vpack.c.bf16 %v2617_v15, %v2617_v15  ;;  %v2620_v18 = vmax.f32 %v2588_v19, 0.0  ;;  %v2586_v52 = vadd.f32 %v4493_v60, %v2547_v16  ;;  %v1717_v50 = vadd.f32 %v1716_v36, %v4469_v39 }
 0x201   : > { %v3319_v44 = vpop.f32.mrf.mxu1 }
 0x202   : > { %2778 = vst.msk [vmem:[%s4504_s12 + $0x60] sm:$0xf] %vm2753_vm6, %v3193_v55  ;;  %v3196_v22 = vpack.c.bf16 %v2620_v18, %v2620_v18  ;;  %v2618_v47 = vmax.f32 %v2586_v52, 0.0  ;;  %v1728_v25 = vadd.f32 %v3319_v44, %v4473_v43 }
 0x203   : > { %v1719_v56 = vpop.f32.mrf.mxu1 }
 0x204   : > { %2781 = vst.msk [vmem:[%s4504_s12 + $0x6c] sm:$0xf] %vm2753_vm6, %v3196_v22  ;;  %v3194_v33 = vpack.c.bf16 %v2618_v47, %v2618_v47  ;;  %v1720_v63 = vadd.f32 %v1719_v56, %v4477_v51 }
 0x205   : > { %v3352_v48 = vpop.f32.mrf.mxu0 }
 0x206   : > { %2779 = vst.msk [vmem:[%s4504_s12 + $0x64] sm:$0xf] %vm2753_vm6, %v3194_v33  ;;  %v2513_v20 = vadd.f32 %v3352_v48, %v1725_v42 }
 0x207   : > { %v2468_v57 = vpop.f32.mrf.mxu0 }
 0x208   : > { %v2552_v14 = vmul.f32 %v4488_v40, %v2513_v20  ;;  %v2511_v59 = vadd.f32 %v2468_v57, %v1717_v50 }
 0x209   : > { %v3353_v21 = vpop.f32.mrf.mxu0 }
 0x20a   : > { %v2591_v12 = vadd.f32 %v4493_v60, %v2552_v14  ;;  %v2550_v37 = vmul.f32 %v4488_v40, %v2511_v59  ;;  %v2514_v28 = vadd.f32 %v3353_v21, %v1728_v25 }
 0x20b   : > { %v2471_v46 = vpop.f32.mrf.mxu0 }
 0x20c   : > { %v2623_v39 = vmax.f32 %v2591_v12, 0.0  ;;  %v2589_v4 = vadd.f32 %v4493_v60, %v2550_v37  ;;  %v2553_v43 = vmul.f32 %v4488_v40, %v2514_v28  ;;  %v2512_v38 = vadd.f32 %v2471_v46, %v1720_v63 }
 0x20e   : > { %v3199_v53 = vpack.c.bf16 %v2623_v39, %v2623_v39  ;;  %v2621_v10 = vmax.f32 %v2589_v4, 0.0  ;;  %v2592_v0 = vadd.f32 %v4493_v60, %v2553_v43  ;;  %v2551_v51 = vmul.f32 %v4488_v40, %v2512_v38 }
 0x210   : > { %2784 = vst.msk [vmem:[%s4504_s12 + $0x78] sm:$0xf] %vm2753_vm6, %v3199_v53  ;;  %v3197_v26 = vpack.c.bf16 %v2621_v10, %v2621_v10  ;;  %v2624_v41 = vmax.f32 %v2592_v0, 0.0  ;;  %v2590_v1 = vadd.f32 %v4493_v60, %v2551_v51 }
 0x212   : > { %2782 = vst.msk [vmem:[%s4504_s12 + $0x70] sm:$0xf] %vm2753_vm6, %v3197_v26  ;;  %v3200_v2 = vpack.c.bf16 %v2624_v41, %v2624_v41  ;;  %v2622_v45 = vmax.f32 %v2590_v1, 0.0 }
 0x214   : > { %2785 = vst.msk [vmem:[%s4504_s12 + $0x7c] sm:$0xf] %vm2753_vm6, %v3200_v2  ;;  %v3198_v3 = vpack.c.bf16 %v2622_v45, %v2622_v45 }
 0x216   : > { %2783 = vst.msk [vmem:[%s4504_s12 + $0x74] sm:$0xf] %vm2753_vm6, %v3198_v3 }
 0x217 PF: > { %s14_s17 = sadd.s32 1, %s3536_s17   ;;  %s4671_s15 = smov %s3532_s16 }
 0x218   : > { %p11_p5 = scmp.ge.s32.totalorder %s14_s17, 4   ;;  %s4672_s16 = smov %s4674_s18 }
 0x21a   :  { %13 = sbr.rel (!%p11_p5) target bundleno = 2 (0x2), region = 71 }

</bundles_post_ra>
